<compile_context>
chip_gen: v7x
topology: tpu7x:2x2x1
jax: 0.10.0
libtpu: 0.0.40
codegen_flags: <defaults>
</compile_context>

<pallas_src>
import numpy as np
import jax
import jax.numpy as jnp
from jax.experimental import pallas as pl
from jax.experimental.pallas import tpu as pltpu

MAX_TM = 1024     # pixel-tile (lane) width for the conv matmul kernel
MAX_TL = 2048     # pixel-tile width for the bilinear combine kernel


def _round_up(x, m):
    return (x + m - 1) // m * m


# ----------------------------------------------------------------------------
# Pallas kernel 1: (Cout,K) @ (K,M) + bias + per-channel PReLU (conv hot path)
# Pixels (M) on the lane axis -> dense stores; K done in one MXU pass.
# ----------------------------------------------------------------------------
def _matmul_bias_prelu_kernel(w_ref, x_ref, b_ref, a_ref, o_ref):
    # w: (Cout,K) bf16, x: (K,TM) bf16, b/a: (Cout,1) f32, o: (Cout,TM) f32
    y = jnp.dot(w_ref[...], x_ref[...], preferred_element_type=jnp.float32)
    y = y + b_ref[...]
    o_ref[...] = jnp.where(y >= 0.0, y, a_ref[...] * y).astype(o_ref.dtype)


def matmul_bias_prelu(wmat, patches, b, alpha):
    """wmat: (Cout,K) bf16, patches: (K,M) bf16, b/alpha: (Cout,) f32."""
    cout, k = wmat.shape
    _, m = patches.shape
    tm = min(MAX_TM, _round_up(m, 128))
    grid = (pl.cdiv(m, tm),)
    b2 = b.reshape(cout, 1).astype(jnp.float32)
    a2 = alpha.reshape(cout, 1).astype(jnp.float32)
    return pl.pallas_call(
        _matmul_bias_prelu_kernel,
        out_shape=jax.ShapeDtypeStruct((cout, m), jnp.float32),
        grid=grid,
        in_specs=[
            pl.BlockSpec((cout, k), lambda i: (0, 0)),
            pl.BlockSpec((k, tm), lambda i: (0, i)),
            pl.BlockSpec((cout, 1), lambda i: (0, 0)),
            pl.BlockSpec((cout, 1), lambda i: (0, 0)),
        ],
        out_specs=pl.BlockSpec((cout, tm), lambda i: (0, i)),
        compiler_params=pltpu.CompilerParams(
            dimension_semantics=("parallel",)),
    )(wmat, patches, b2, a2)


# ----------------------------------------------------------------------------
# Convolution wrappers (im2col glue in (K, M) bf16 layout + Pallas matmul)
# ----------------------------------------------------------------------------
def conv2d_act(x, w, b, alpha, stride=1, pad=1):
    """Conv2d + bias + per-channel PReLU.

    x: (Cin, N, H, W) internal "channels outermost" layout.
    w: (Cout, Cin, kh, kw).  Returns (Cout, N, OH, OW) float32.
    """
    cout, cin, kh, kw = w.shape
    c, n, h, wd = x.shape
    xp = jnp.pad(x, ((0, 0), (0, 0), (pad, pad), (pad, pad)))
    oh = (h + 2 * pad - kh) // stride + 1
    ow = (wd + 2 * pad - kw) // stride + 1
    # TODO(synk): fuse this patch extraction into the Pallas kernel (halo DMA /
    # shifted accumulating dots) to avoid materializing the (K, M) matrix in HBM.
    patches = [xp[:, :, i:i + stride * oh:stride, j:j + stride * ow:stride]
               for i in range(kh) for j in range(kw)]
    pm = jnp.stack(patches, axis=1)                        # (Cin, kh*kw, N, OH, OW)
    pm = pm.reshape(cin * kh * kw, n * oh * ow).astype(jnp.bfloat16)
    wmat = w.reshape(cout, cin * kh * kw).astype(jnp.bfloat16)
    out = matmul_bias_prelu(wmat, pm, b, alpha)            # (Cout, N*OH*OW) f32
    return out.reshape(cout, n, oh, ow)


def conv_transpose2d(x, w, b):
    """ConvTranspose2d(kernel=4, stride=2, padding=1) via sub-pixel decomposition.

    x: (Cin, N, H, W); w: (Cin, Cout, 4, 4) (PyTorch layout); b: (Cout,).
    Exactly equivalent math, expressed as one 2x2 conv with 4*Cout channels
    (one group per output-pixel phase) followed by depth-to-space.
    """
    cin, cout, kh, kw = w.shape
    c, n, h, wd = x.shape
    groups = []
    for ry in (0, 1):
        ty = (3, 1) if ry == 0 else (2, 0)
        for rx in (0, 1):
            tx = (3, 1) if rx == 0 else (2, 0)
            wk = jnp.stack(
                [jnp.stack([w[:, :, ty[a], tx[bb]] for bb in (0, 1)], axis=-1)
                 for a in (0, 1)], axis=-2)                # (Cin, Cout, 2, 2)
            groups.append(jnp.transpose(wk, (1, 0, 2, 3)))  # (Cout, Cin, 2, 2)
    w_sub = jnp.concatenate(groups, axis=0)                # (4*Cout, Cin, 2, 2)
    b_sub = jnp.tile(b, 4)
    alpha_id = jnp.ones((4 * cout,), jnp.float32)          # PReLU slope 1 == identity
    sub = conv2d_act(x, w_sub, b_sub, alpha_id, stride=1, pad=1)  # (4C,N,H+1,W+1)
    sub = sub.reshape(2, 2, cout, n, h + 1, wd + 1)
    rows = [jnp.stack([sub[ry, rx, :, :, ry:ry + h, rx:rx + wd] for rx in (0, 1)],
                      axis=-1) for ry in (0, 1)]           # each (Cout,N,H,W,2)
    full = jnp.stack(rows, axis=-3)                        # (Cout,N,H,2,W,2)
    return full.reshape(cout, n, 2 * h, 2 * wd)


# ----------------------------------------------------------------------------
# Pallas kernel 2: 4-tap bilinear combine (lane-dense, weights broadcast)
# ----------------------------------------------------------------------------
def _bilinear_combine_kernel(a_ref, b_ref, c_ref, d_ref,
                             wa_ref, wb_ref, wc_ref, wd_ref, o_ref):
    o_ref[...] = (wa_ref[...] * a_ref[...] + wb_ref[...] * b_ref[...] +
                  wc_ref[...] * c_ref[...] + wd_ref[...] * d_ref[...])


def _bilinear_combine(a, b, c, d, wa, wb, wc, wd):
    bc, p = a.shape
    tl = min(MAX_TL, _round_up(p, 128))
    grid = (pl.cdiv(p, tl),)
    xspec = pl.BlockSpec((bc, tl), lambda i: (0, i))
    wspec = pl.BlockSpec((1, tl), lambda i: (0, i))
    return pl.pallas_call(
        _bilinear_combine_kernel,
        out_shape=jax.ShapeDtypeStruct((bc, p), jnp.float32),
        grid=grid,
        in_specs=[xspec] * 4 + [wspec] * 4,
        out_specs=pl.BlockSpec((bc, tl), lambda i: (0, i)),
        compiler_params=pltpu.CompilerParams(
            dimension_semantics=("parallel",)),
    )(a, b, c, d, wa, wb, wc, wd)


def custom_bilinear_interpolation(x, scale_factor, out_scale=1.0):
    """Replicates the PyTorch custom_bilinear_interpolation.

    x: (C, N, H, W) internal layout.  out_scale folds the flow `* 1/scale`."""
    c, n, h, w = x.shape
    new_h = int(h * scale_factor)
    new_w = int(w * scale_factor)
    yg = (np.arange(new_h, dtype=np.float32) + 0.5) / scale_factor - 0.5
    xg = (np.arange(new_w, dtype=np.float32) + 0.5) / scale_factor - 0.5
    y0 = np.clip(np.floor(yg).astype(np.int64), 0, h - 1)
    y1 = np.clip(np.floor(yg).astype(np.int64) + 1, 0, h - 1)
    x0 = np.clip(np.floor(xg).astype(np.int64), 0, w - 1)
    x1 = np.clip(np.floor(xg).astype(np.int64) + 1, 0, w - 1)
    dy = (yg - y0.astype(np.float32))[:, None]             # (new_h, 1)
    dx = (xg - x0.astype(np.float32))[None, :]             # (1, new_w)
    wa = ((1.0 - dx) * (1.0 - dy) * out_scale).astype(np.float32)
    wb = ((1.0 - dx) * dy * out_scale).astype(np.float32)
    wc = (dx * (1.0 - dy) * out_scale).astype(np.float32)
    wd = (dx * dy * out_scale).astype(np.float32)

    # Static-index 1-D gathers (separable taps); weighted combine runs in Pallas.
    # TODO(synk): fold the fixed 2x2-tap gather into the combine kernel (strided
    # DMA) so the source frame is read once instead of four times.
    xy0 = x[:, :, y0, :]
    xy1 = x[:, :, y1, :]
    a = xy0[:, :, :, x0]
    b = xy1[:, :, :, x0]
    cc = xy0[:, :, :, x1]
    d = xy1[:, :, :, x1]

    p = new_h * new_w
    flat = lambda v: v.reshape(c * n, p).astype(jnp.float32)
    flatw = lambda wv: jnp.asarray(wv.reshape(1, p))
    out = _bilinear_combine(flat(a), flat(b), flat(cc), flat(d),
                            flatw(wa), flatw(wb), flatw(wc), flatw(wd))
    return out.reshape(c, n, new_h, new_w)


# ----------------------------------------------------------------------------
# EFBlock parameters + forward
# ----------------------------------------------------------------------------
def _init_conv(key, cin, cout, kh=3, kw=3):
    k1, k2 = jax.random.split(key)
    return dict(
        w=jax.random.normal(k1, (cout, cin, kh, kw), jnp.float32) * 0.1,
        b=jax.random.normal(k2, (cout,), jnp.float32) * 0.01,
        alpha=jnp.full((cout,), 0.25, jnp.float32),   # PyTorch PReLU default
    )


def init_efblock_params(key, in_planes, num_feature):
    keys = jax.random.split(key, 10)
    nf = num_feature
    p = {}
    p["conv0_0"] = _init_conv(keys[0], in_planes, nf // 2)
    p["conv0_1"] = _init_conv(keys[1], nf // 2, nf)
    p["cb_0"] = _init_conv(keys[2], nf, nf)
    p["cb_1"] = _init_conv(keys[3], nf, nf)
    p["cb_2"] = _init_conv(keys[4], nf, nf)
    p["conv_sq"] = _init_conv(keys[5], nf, nf // 4)
    p["conv1"] = _init_conv(keys[6], in_planes, 8)
    p["cb1_0"] = _init_conv(keys[7], 8, 8)
    p["lastconv"] = dict(
        w=jax.random.normal(keys[8], (nf // 4 + 8, 5, 4, 4), jnp.float32) * 0.1,
        b=jax.random.normal(keys[9], (5,), jnp.float32) * 0.01,
    )
    return p


def efblock_forward(params, x, flow, scale):
    """x, flow in NCHW (PyTorch interface).  Returns (flow_out, mask) in NCHW."""
    # Internal layout: channels outermost (C, N, H, W) -> no per-layer transposes.
    x_c = jnp.transpose(x, (1, 0, 2, 3))
    flow_c = jnp.transpose(flow, (1, 0, 2, 3))
    x0, flow0 = x_c, flow_c
    if scale != 1:
        x_c = custom_bilinear_interpolation(x_c, 1.0 / scale)
        flow_c = custom_bilinear_interpolation(flow_c, 1.0 / scale,
                                               out_scale=1.0 / scale)
    xc = jnp.concatenate([x_c, flow_c], axis=0)

    x1 = conv2d_act(xc, **params["conv0_0"], stride=2, pad=1)
    x1 = conv2d_act(x1, **params["conv0_1"], stride=2, pad=1)

    t = conv2d_act(x1, **params["cb_0"])
    t = conv2d_act(t, **params["cb_1"])
    t = conv2d_act(t, **params["cb_2"])

    x2 = conv2d_act(t + x1, **params["conv_sq"])
    x2 = custom_bilinear_interpolation(x2, scale * 2)

    x3 = conv2d_act(jnp.concatenate([x0, flow0], axis=0),
                    **params["conv1"], stride=2, pad=1)
    # TODO(synk): multiRF is an externally supplied submodule (constructor arg);
    # modeled as identity here since its definition is not part of EFBlock.
    x3_2 = x3
    x4 = conv2d_act(x3_2, **params["cb1_0"])

    tmp = conv_transpose2d(jnp.concatenate([x2, x4], axis=0),
                           params["lastconv"]["w"], params["lastconv"]["b"])
    flow_out = jnp.transpose(tmp[:4], (1, 0, 2, 3))
    mask = jnp.transpose(tmp[4:5], (1, 0, 2, 3))
    return flow_out, mask


if __name__ == "__main__":
    key = jax.random.PRNGKey(0)
    kp, kx, kf = jax.random.split(key, 3)

    B, Cx, H, W = 2, 3, 16, 16
    flow_ch = 4
    in_planes = Cx + flow_ch          # x and flow are concatenated in forward
    num_feature = 32
    scale = 2.0

    params = init_efblock_params(kp, in_planes, num_feature)
    x = jax.random.normal(kx, (B, Cx, H, W), jnp.float32)
    flow = jax.random.normal(kf, (B, flow_ch, H, W), jnp.float32)

    fwd = jax.jit(efblock_forward, static_argnames=("scale",))
    flow_out, mask = fwd(params, x, flow, scale=scale)
    jax.block_until_ready((flow_out, mask))

    assert flow_out.shape == (B, 4, H, W), flow_out.shape
    assert mask.shape == (B, 1, H, W), mask.shape
    assert flow_out.dtype == jnp.float32 and mask.dtype == jnp.float32
    assert bool(jnp.all(jnp.isfinite(flow_out))) and bool(jnp.all(jnp.isfinite(mask)))
    print("KERNEL_OK")
</pallas_src>

<mosaic_0001>
module attributes {stable_mosaic.version = 11 : i64} {
  func.func @_bilinear_combine_kernel(%arg0: i32, %arg1: memref<8x128xf32, #tpu.memory_space<vmem>>, %arg2: memref<8x128xf32, #tpu.memory_space<vmem>>, %arg3: memref<8x128xf32, #tpu.memory_space<vmem>>, %arg4: memref<8x128xf32, #tpu.memory_space<vmem>>, %arg5: memref<1x128xf32, #tpu.memory_space<vmem>>, %arg6: memref<1x128xf32, #tpu.memory_space<vmem>>, %arg7: memref<1x128xf32, #tpu.memory_space<vmem>>, %arg8: memref<1x128xf32, #tpu.memory_space<vmem>>, %arg9: memref<8x128xf32, #tpu.memory_space<vmem>>) attributes {dimension_semantics = [#tpu.dimension_semantics<parallel>], iteration_bounds = array<i64: 1>, scalar_prefetch = 0 : i64, scratch_operands = 0 : i64, tpu.core_type = #tpu.core_type<tc>, window_params = [{transform_indices = @transform_0, window_bounds = array<i64: 8, 128>}, {transform_indices = @transform_1, window_bounds = array<i64: 8, 128>}, {transform_indices = @transform_2, window_bounds = array<i64: 8, 128>}, {transform_indices = @transform_3, window_bounds = array<i64: 8, 128>}, {transform_indices = @transform_4, window_bounds = array<i64: 1, 128>}, {transform_indices = @transform_5, window_bounds = array<i64: 1, 128>}, {transform_indices = @transform_6, window_bounds = array<i64: 1, 128>}, {transform_indices = @transform_7, window_bounds = array<i64: 1, 128>}, {transform_indices = @transform_8, window_bounds = array<i64: 8, 128>}]} {
    %c0 = arith.constant 0 : index
    %c0_0 = arith.constant 0 : index
    %0 = vector.load %arg5[%c0, %c0_0] : memref<1x128xf32, #tpu.memory_space<vmem>>, vector<1x128xf32>
    %c0_1 = arith.constant 0 : index
    %c0_2 = arith.constant 0 : index
    %1 = vector.load %arg1[%c0_1, %c0_2] : memref<8x128xf32, #tpu.memory_space<vmem>>, vector<8x128xf32>
    %2 = vector.broadcast %0 : vector<1x128xf32> to vector<8x128xf32>
    %3 = arith.mulf %2, %1 : vector<8x128xf32>
    %c0_3 = arith.constant 0 : index
    %c0_4 = arith.constant 0 : index
    %4 = vector.load %arg6[%c0_3, %c0_4] : memref<1x128xf32, #tpu.memory_space<vmem>>, vector<1x128xf32>
    %c0_5 = arith.constant 0 : index
    %c0_6 = arith.constant 0 : index
    %5 = vector.load %arg2[%c0_5, %c0_6] : memref<8x128xf32, #tpu.memory_space<vmem>>, vector<8x128xf32>
    %6 = vector.broadcast %4 : vector<1x128xf32> to vector<8x128xf32>
    %7 = arith.mulf %6, %5 : vector<8x128xf32>
    %8 = arith.addf %3, %7 : vector<8x128xf32>
    %c0_7 = arith.constant 0 : index
    %c0_8 = arith.constant 0 : index
    %9 = vector.load %arg7[%c0_7, %c0_8] : memref<1x128xf32, #tpu.memory_space<vmem>>, vector<1x128xf32>
    %c0_9 = arith.constant 0 : index
    %c0_10 = arith.constant 0 : index
    %10 = vector.load %arg3[%c0_9, %c0_10] : memref<8x128xf32, #tpu.memory_space<vmem>>, vector<8x128xf32>
    %11 = vector.broadcast %9 : vector<1x128xf32> to vector<8x128xf32>
    %12 = arith.mulf %11, %10 : vector<8x128xf32>
    %13 = arith.addf %8, %12 : vector<8x128xf32>
    %c0_11 = arith.constant 0 : index
    %c0_12 = arith.constant 0 : index
    %14 = vector.load %arg8[%c0_11, %c0_12] : memref<1x128xf32, #tpu.memory_space<vmem>>, vector<1x128xf32>
    %c0_13 = arith.constant 0 : index
    %c0_14 = arith.constant 0 : index
    %15 = vector.load %arg4[%c0_13, %c0_14] : memref<8x128xf32, #tpu.memory_space<vmem>>, vector<8x128xf32>
    %16 = vector.broadcast %14 : vector<1x128xf32> to vector<8x128xf32>
    %17 = arith.mulf %16, %15 : vector<8x128xf32>
    %18 = arith.addf %13, %17 : vector<8x128xf32>
    %c0_15 = arith.constant 0 : index
    %c0_16 = arith.constant 0 : index
    %19 = vector.load %arg9[%c0_15, %c0_16] : memref<8x128xf32, #tpu.memory_space<vmem>>, vector<8x128xf32>
    tpu.vector_store %arg9[%c0_15, %c0_16], %18 {strides = array<i32>} : memref<8x128xf32, #tpu.memory_space<vmem>>, vector<8x128xf32>,
    return
  }
  func.func @transform_0(%arg0: i32) -> (i32, i32) {
    %c0_i32 = arith.constant 0 : i32
    %c0_i32_0 = arith.constant 0 : i32
    return %c0_i32, %arg0 : i32, i32
  }
  func.func @transform_1(%arg0: i32) -> (i32, i32) {
    %c0_i32 = arith.constant 0 : i32
    %c0_i32_0 = arith.constant 0 : i32
    return %c0_i32, %arg0 : i32, i32
  }
  func.func @transform_2(%arg0: i32) -> (i32, i32) {
    %c0_i32 = arith.constant 0 : i32
    %c0_i32_0 = arith.constant 0 : i32
    return %c0_i32, %arg0 : i32, i32
  }
  func.func @transform_3(%arg0: i32) -> (i32, i32) {
    %c0_i32 = arith.constant 0 : i32
    %c0_i32_0 = arith.constant 0 : i32
    return %c0_i32, %arg0 : i32, i32
  }
  func.func @transform_4(%arg0: i32) -> (i32, i32) {
    %c0_i32 = arith.constant 0 : i32
    %c0_i32_0 = arith.constant 0 : i32
    return %c0_i32, %arg0 : i32, i32
  }
  func.func @transform_5(%arg0: i32) -> (i32, i32) {
    %c0_i32 = arith.constant 0 : i32
    %c0_i32_0 = arith.constant 0 : i32
    return %c0_i32, %arg0 : i32, i32
  }
  func.func @transform_6(%arg0: i32) -> (i32, i32) {
    %c0_i32 = arith.constant 0 : i32
    %c0_i32_0 = arith.constant 0 : i32
    return %c0_i32, %arg0 : i32, i32
  }
  func.func @transform_7(%arg0: i32) -> (i32, i32) {
    %c0_i32 = arith.constant 0 : i32
    %c0_i32_0 = arith.constant 0 : i32
    return %c0_i32, %arg0 : i32, i32
  }
  func.func @transform_8(%arg0: i32) -> (i32, i32) {
    %c0_i32 = arith.constant 0 : i32
    %c0_i32_0 = arith.constant 0 : i32
    return %c0_i32, %arg0 : i32, i32
  }
}

module attributes {stable_mosaic.version = 11 : i64} {
  func.func @_bilinear_combine_kernel(%arg0: i32, %arg1: memref<6x128xf32, #tpu.memory_space<vmem>>, %arg2: memref<6x128xf32, #tpu.memory_space<vmem>>, %arg3: memref<6x128xf32, #tpu.memory_space<vmem>>, %arg4: memref<6x128xf32, #tpu.memory_space<vmem>>, %arg5: memref<1x128xf32, #tpu.memory_space<vmem>>, %arg6: memref<1x128xf32, #tpu.memory_space<vmem>>, %arg7: memref<1x128xf32, #tpu.memory_space<vmem>>, %arg8: memref<1x128xf32, #tpu.memory_space<vmem>>, %arg9: memref<6x128xf32, #tpu.memory_space<vmem>>) attributes {dimension_semantics = [#tpu.dimension_semantics<parallel>], iteration_bounds = array<i64: 1>, scalar_prefetch = 0 : i64, scratch_operands = 0 : i64, tpu.core_type = #tpu.core_type<tc>, window_params = [{transform_indices = @transform_0, window_bounds = array<i64: 6, 128>}, {transform_indices = @transform_1, window_bounds = array<i64: 6, 128>}, {transform_indices = @transform_2, window_bounds = array<i64: 6, 128>}, {transform_indices = @transform_3, window_bounds = array<i64: 6, 128>}, {transform_indices = @transform_4, window_bounds = array<i64: 1, 128>}, {transform_indices = @transform_5, window_bounds = array<i64: 1, 128>}, {transform_indices = @transform_6, window_bounds = array<i64: 1, 128>}, {transform_indices = @transform_7, window_bounds = array<i64: 1, 128>}, {transform_indices = @transform_8, window_bounds = array<i64: 6, 128>}]} {
    %c0 = arith.constant 0 : index
    %c0_0 = arith.constant 0 : index
    %0 = vector.load %arg5[%c0, %c0_0] : memref<1x128xf32, #tpu.memory_space<vmem>>, vector<1x128xf32>
    %c0_1 = arith.constant 0 : index
    %c0_2 = arith.constant 0 : index
    %1 = vector.load %arg1[%c0_1, %c0_2] : memref<6x128xf32, #tpu.memory_space<vmem>>, vector<6x128xf32>
    %2 = vector.broadcast %0 : vector<1x128xf32> to vector<6x128xf32>
    %3 = arith.mulf %2, %1 : vector<6x128xf32>
    %c0_3 = arith.constant 0 : index
    %c0_4 = arith.constant 0 : index
    %4 = vector.load %arg6[%c0_3, %c0_4] : memref<1x128xf32, #tpu.memory_space<vmem>>, vector<1x128xf32>
    %c0_5 = arith.constant 0 : index
    %c0_6 = arith.constant 0 : index
    %5 = vector.load %arg2[%c0_5, %c0_6] : memref<6x128xf32, #tpu.memory_space<vmem>>, vector<6x128xf32>
    %6 = vector.broadcast %4 : vector<1x128xf32> to vector<6x128xf32>
    %7 = arith.mulf %6, %5 : vector<6x128xf32>
    %8 = arith.addf %3, %7 : vector<6x128xf32>
    %c0_7 = arith.constant 0 : index
    %c0_8 = arith.constant 0 : index
    %9 = vector.load %arg7[%c0_7, %c0_8] : memref<1x128xf32, #tpu.memory_space<vmem>>, vector<1x128xf32>
    %c0_9 = arith.constant 0 : index
    %c0_10 = arith.constant 0 : index
    %10 = vector.load %arg3[%c0_9, %c0_10] : memref<6x128xf32, #tpu.memory_space<vmem>>, vector<6x128xf32>
    %11 = vector.broadcast %9 : vector<1x128xf32> to vector<6x128xf32>
    %12 = arith.mulf %11, %10 : vector<6x128xf32>
    %13 = arith.addf %8, %12 : vector<6x128xf32>
    %c0_11 = arith.constant 0 : index
    %c0_12 = arith.constant 0 : index
    %14 = vector.load %arg8[%c0_11, %c0_12] : memref<1x128xf32, #tpu.memory_space<vmem>>, vector<1x128xf32>
    %c0_13 = arith.constant 0 : index
    %c0_14 = arith.constant 0 : index
    %15 = vector.load %arg4[%c0_13, %c0_14] : memref<6x128xf32, #tpu.memory_space<vmem>>, vector<6x128xf32>
    %16 = vector.broadcast %14 : vector<1x128xf32> to vector<6x128xf32>
    %17 = arith.mulf %16, %15 : vector<6x128xf32>
    %18 = arith.addf %13, %17 : vector<6x128xf32>
    %c0_15 = arith.constant 0 : index
    %c0_16 = arith.constant 0 : index
    %19 = vector.load %arg9[%c0_15, %c0_16] : memref<6x128xf32, #tpu.memory_space<vmem>>, vector<6x128xf32>
    tpu.vector_store %arg9[%c0_15, %c0_16], %18 {strides = array<i32>} : memref<6x128xf32, #tpu.memory_space<vmem>>, vector<6x128xf32>,
    return
  }
  func.func @transform_0(%arg0: i32) -> (i32, i32) {
    %c0_i32 = arith.constant 0 : i32
    %c0_i32_0 = arith.constant 0 : i32
    return %c0_i32, %arg0 : i32, i32
  }
  func.func @transform_1(%arg0: i32) -> (i32, i32) {
    %c0_i32 = arith.constant 0 : i32
    %c0_i32_0 = arith.constant 0 : i32
    return %c0_i32, %arg0 : i32, i32
  }
  func.func @transform_2(%arg0: i32) -> (i32, i32) {
    %c0_i32 = arith.constant 0 : i32
    %c0_i32_0 = arith.constant 0 : i32
    return %c0_i32, %arg0 : i32, i32
  }
  func.func @transform_3(%arg0: i32) -> (i32, i32) {
    %c0_i32 = arith.constant 0 : i32
    %c0_i32_0 = arith.constant 0 : i32
    return %c0_i32, %arg0 : i32, i32
  }
  func.func @transform_4(%arg0: i32) -> (i32, i32) {
    %c0_i32 = arith.constant 0 : i32
    %c0_i32_0 = arith.constant 0 : i32
    return %c0_i32, %arg0 : i32, i32
  }
  func.func @transform_5(%arg0: i32) -> (i32, i32) {
    %c0_i32 = arith.constant 0 : i32
    %c0_i32_0 = arith.constant 0 : i32
    return %c0_i32, %arg0 : i32, i32
  }
  func.func @transform_6(%arg0: i32) -> (i32, i32) {
    %c0_i32 = arith.constant 0 : i32
    %c0_i32_0 = arith.constant 0 : i32
    return %c0_i32, %arg0 : i32, i32
  }
  func.func @transform_7(%arg0: i32) -> (i32, i32) {
    %c0_i32 = arith.constant 0 : i32
    %c0_i32_0 = arith.constant 0 : i32
    return %c0_i32, %arg0 : i32, i32
  }
  func.func @transform_8(%arg0: i32) -> (i32, i32) {
    %c0_i32 = arith.constant 0 : i32
    %c0_i32_0 = arith.constant 0 : i32
    return %c0_i32, %arg0 : i32, i32
  }
}

module attributes {stable_mosaic.version = 11 : i64} {
  func.func @_matmul_bias_prelu_kernel(%arg0: i32, %arg1: memref<16x63xbf16, #tpu.memory_space<vmem>>, %arg2: memref<63x128xbf16, #tpu.memory_space<vmem>>, %arg3: memref<16x1xf32, #tpu.memory_space<vmem>>, %arg4: memref<16x1xf32, #tpu.memory_space<vmem>>, %arg5: memref<16x128xf32, #tpu.memory_space<vmem>>) attributes {dimension_semantics = [#tpu.dimension_semantics<parallel>], iteration_bounds = array<i64: 1>, scalar_prefetch = 0 : i64, scratch_operands = 0 : i64, tpu.core_type = #tpu.core_type<tc>, window_params = [{pipeline_mode = #tpu.pipeline_mode<synchronous>, transform_indices = @transform_0, window_bounds = array<i64: 16, 63>}, {transform_indices = @transform_1, window_bounds = array<i64: 63, 128>}, {pipeline_mode = #tpu.pipeline_mode<synchronous>, transform_indices = @transform_2, window_bounds = array<i64: 16, 1>}, {pipeline_mode = #tpu.pipeline_mode<synchronous>, transform_indices = @transform_3, window_bounds = array<i64: 16, 1>}, {transform_indices = @transform_4, window_bounds = array<i64: 16, 128>}]} {
    %c0 = arith.constant 0 : index
    %c0_0 = arith.constant 0 : index
    %0 = vector.load %arg1[%c0, %c0_0] : memref<16x63xbf16, #tpu.memory_space<vmem>>, vector<16x63xbf16>
    %c0_1 = arith.constant 0 : index
    %c0_2 = arith.constant 0 : index
    %1 = vector.load %arg2[%c0_1, %c0_2] : memref<63x128xbf16, #tpu.memory_space<vmem>>, vector<63x128xbf16>
    %cst = arith.constant dense<0.000000e+00> : vector<16x128xf32>
    %2 = tpu.matmul %0, %1, %cst {dimension_numbers = #tpu.dot_dimension_numbers<[1], [0], [0], [1], [0, 0, 1, 1], [], []>} : vector<16x63xbf16>, vector<63x128xbf16>, vector<16x128xf32> -> vector<16x128xf32>
    %c0_3 = arith.constant 0 : index
    %c0_4 = arith.constant 0 : index
    %3 = vector.load %arg3[%c0_3, %c0_4] : memref<16x1xf32, #tpu.memory_space<vmem>>, vector<16x1xf32>
    %4 = vector.broadcast %3 : vector<16x1xf32> to vector<16x128xf32>
    %5 = arith.addf %2, %4 : vector<16x128xf32>
    %cst_5 = arith.constant 0.000000e+00 : f32
    %6 = vector.broadcast %cst_5 : f32 to vector<16x128xf32>
    %7 = arith.cmpf oge, %5, %6 : vector<16x128xf32>
    %c0_6 = arith.constant 0 : index
    %c0_7 = arith.constant 0 : index
    %8 = vector.load %arg4[%c0_6, %c0_7] : memref<16x1xf32, #tpu.memory_space<vmem>>, vector<16x1xf32>
    %9 = vector.broadcast %8 : vector<16x1xf32> to vector<16x128xf32>
    %10 = arith.mulf %9, %5 : vector<16x128xf32>
    %11 = arith.select %7, %5, %10 : vector<16x128xi1>, vector<16x128xf32>
    %c0_8 = arith.constant 0 : index
    %c0_9 = arith.constant 0 : index
    %12 = vector.load %arg5[%c0_8, %c0_9] : memref<16x128xf32, #tpu.memory_space<vmem>>, vector<16x128xf32>
    tpu.vector_store %arg5[%c0_8, %c0_9], %11 {strides = array<i32>} : memref<16x128xf32, #tpu.memory_space<vmem>>, vector<16x128xf32>,
    return
  }
  func.func @transform_0(%arg0: i32) -> (i32, i32) {
    %c0_i32 = arith.constant 0 : i32
    %c0_i32_0 = arith.constant 0 : i32
    %c0_i32_1 = arith.constant 0 : i32
    return %c0_i32, %c0_i32_0 : i32, i32
  }
  func.func @transform_1(%arg0: i32) -> (i32, i32) {
    %c0_i32 = arith.constant 0 : i32
    %c0_i32_0 = arith.constant 0 : i32
    return %c0_i32, %arg0 : i32, i32
  }
  func.func @transform_2(%arg0: i32) -> (i32, i32) {
    %c0_i32 = arith.constant 0 : i32
    %c0_i32_0 = arith.constant 0 : i32
    %c0_i32_1 = arith.constant 0 : i32
    return %c0_i32, %c0_i32_0 : i32, i32
  }
  func.func @transform_3(%arg0: i32) -> (i32, i32) {
    %c0_i32 = arith.constant 0 : i32
    %c0_i32_0 = arith.constant 0 : i32
    %c0_i32_1 = arith.constant 0 : i32
    return %c0_i32, %c0_i32_0 : i32, i32
  }
  func.func @transform_4(%arg0: i32) -> (i32, i32) {
    %c0_i32 = arith.constant 0 : i32
    %c0_i32_0 = arith.constant 0 : i32
    return %c0_i32, %arg0 : i32, i32
  }
}

module attributes {stable_mosaic.version = 11 : i64} {
  func.func @_matmul_bias_prelu_kernel(%arg0: i32, %arg1: memref<32x144xbf16, #tpu.memory_space<vmem>>, %arg2: memref<144x128xbf16, #tpu.memory_space<vmem>>, %arg3: memref<32x1xf32, #tpu.memory_space<vmem>>, %arg4: memref<32x1xf32, #tpu.memory_space<vmem>>, %arg5: memref<32x128xf32, #tpu.memory_space<vmem>>) attributes {dimension_semantics = [#tpu.dimension_semantics<parallel>], iteration_bounds = array<i64: 1>, scalar_prefetch = 0 : i64, scratch_operands = 0 : i64, tpu.core_type = #tpu.core_type<tc>, window_params = [{pipeline_mode = #tpu.pipeline_mode<synchronous>, transform_indices = @transform_0, window_bounds = array<i64: 32, 144>}, {transform_indices = @transform_1, window_bounds = array<i64: 144, 128>}, {pipeline_mode = #tpu.pipeline_mode<synchronous>, transform_indices = @transform_2, window_bounds = array<i64: 32, 1>}, {pipeline_mode = #tpu.pipeline_mode<synchronous>, transform_indices = @transform_3, window_bounds = array<i64: 32, 1>}, {transform_indices = @transform_4, window_bounds = array<i64: 32, 128>}]} {
    %c0 = arith.constant 0 : index
    %c0_0 = arith.constant 0 : index
    %0 = vector.load %arg1[%c0, %c0_0] : memref<32x144xbf16, #tpu.memory_space<vmem>>, vector<32x144xbf16>
    %c0_1 = arith.constant 0 : index
    %c0_2 = arith.constant 0 : index
    %1 = vector.load %arg2[%c0_1, %c0_2] : memref<144x128xbf16, #tpu.memory_space<vmem>>, vector<144x128xbf16>
    %cst = arith.constant dense<0.000000e+00> : vector<32x128xf32>
    %2 = tpu.matmul %0, %1, %cst {dimension_numbers = #tpu.dot_dimension_numbers<[1], [0], [0], [1], [0, 0, 1, 1], [], []>} : vector<32x144xbf16>, vector<144x128xbf16>, vector<32x128xf32> -> vector<32x128xf32>
    %c0_3 = arith.constant 0 : index
    %c0_4 = arith.constant 0 : index
    %3 = vector.load %arg3[%c0_3, %c0_4] : memref<32x1xf32, #tpu.memory_space<vmem>>, vector<32x1xf32>
    %4 = vector.broadcast %3 : vector<32x1xf32> to vector<32x128xf32>
    %5 = arith.addf %2, %4 : vector<32x128xf32>
    %cst_5 = arith.constant 0.000000e+00 : f32
    %6 = vector.broadcast %cst_5 : f32 to vector<32x128xf32>
    %7 = arith.cmpf oge, %5, %6 : vector<32x128xf32>
    %c0_6 = arith.constant 0 : index
    %c0_7 = arith.constant 0 : index
    %8 = vector.load %arg4[%c0_6, %c0_7] : memref<32x1xf32, #tpu.memory_space<vmem>>, vector<32x1xf32>
    %9 = vector.broadcast %8 : vector<32x1xf32> to vector<32x128xf32>
    %10 = arith.mulf %9, %5 : vector<32x128xf32>
    %11 = arith.select %7, %5, %10 : vector<32x128xi1>, vector<32x128xf32>
    %c0_8 = arith.constant 0 : index
    %c0_9 = arith.constant 0 : index
    %12 = vector.load %arg5[%c0_8, %c0_9] : memref<32x128xf32, #tpu.memory_space<vmem>>, vector<32x128xf32>
    tpu.vector_store %arg5[%c0_8, %c0_9], %11 {strides = array<i32>} : memref<32x128xf32, #tpu.memory_space<vmem>>, vector<32x128xf32>,
    return
  }
  func.func @transform_0(%arg0: i32) -> (i32, i32) {
    %c0_i32 = arith.constant 0 : i32
    %c0_i32_0 = arith.constant 0 : i32
    %c0_i32_1 = arith.constant 0 : i32
    return %c0_i32, %c0_i32_0 : i32, i32
  }
  func.func @transform_1(%arg0: i32) -> (i32, i32) {
    %c0_i32 = arith.constant 0 : i32
    %c0_i32_0 = arith.constant 0 : i32
    return %c0_i32, %arg0 : i32, i32
  }
  func.func @transform_2(%arg0: i32) -> (i32, i32) {
    %c0_i32 = arith.constant 0 : i32
    %c0_i32_0 = arith.constant 0 : i32
    %c0_i32_1 = arith.constant 0 : i32
    return %c0_i32, %c0_i32_0 : i32, i32
  }
  func.func @transform_3(%arg0: i32) -> (i32, i32) {
    %c0_i32 = arith.constant 0 : i32
    %c0_i32_0 = arith.constant 0 : i32
    %c0_i32_1 = arith.constant 0 : i32
    return %c0_i32, %c0_i32_0 : i32, i32
  }
  func.func @transform_4(%arg0: i32) -> (i32, i32) {
    %c0_i32 = arith.constant 0 : i32
    %c0_i32_0 = arith.constant 0 : i32
    return %c0_i32, %arg0 : i32, i32
  }
}

module attributes {stable_mosaic.version = 11 : i64} {
  func.func @_matmul_bias_prelu_kernel(%arg0: i32, %arg1: memref<32x288xbf16, #tpu.memory_space<vmem>>, %arg2: memref<288x128xbf16, #tpu.memory_space<vmem>>, %arg3: memref<32x1xf32, #tpu.memory_space<vmem>>, %arg4: memref<32x1xf32, #tpu.memory_space<vmem>>, %arg5: memref<32x128xf32, #tpu.memory_space<vmem>>) attributes {dimension_semantics = [#tpu.dimension_semantics<parallel>], iteration_bounds = array<i64: 1>, scalar_prefetch = 0 : i64, scratch_operands = 0 : i64, tpu.core_type = #tpu.core_type<tc>, window_params = [{pipeline_mode = #tpu.pipeline_mode<synchronous>, transform_indices = @transform_0, window_bounds = array<i64: 32, 288>}, {transform_indices = @transform_1, window_bounds = array<i64: 288, 128>}, {pipeline_mode = #tpu.pipeline_mode<synchronous>, transform_indices = @transform_2, window_bounds = array<i64: 32, 1>}, {pipeline_mode = #tpu.pipeline_mode<synchronous>, transform_indices = @transform_3, window_bounds = array<i64: 32, 1>}, {transform_indices = @transform_4, window_bounds = array<i64: 32, 128>}]} {
    %c0 = arith.constant 0 : index
    %c0_0 = arith.constant 0 : index
    %0 = vector.load %arg1[%c0, %c0_0] : memref<32x288xbf16, #tpu.memory_space<vmem>>, vector<32x288xbf16>
    %c0_1 = arith.constant 0 : index
    %c0_2 = arith.constant 0 : index
    %1 = vector.load %arg2[%c0_1, %c0_2] : memref<288x128xbf16, #tpu.memory_space<vmem>>, vector<288x128xbf16>
    %cst = arith.constant dense<0.000000e+00> : vector<32x128xf32>
    %2 = tpu.matmul %0, %1, %cst {dimension_numbers = #tpu.dot_dimension_numbers<[1], [0], [0], [1], [0, 0, 1, 1], [], []>} : vector<32x288xbf16>, vector<288x128xbf16>, vector<32x128xf32> -> vector<32x128xf32>
    %c0_3 = arith.constant 0 : index
    %c0_4 = arith.constant 0 : index
    %3 = vector.load %arg3[%c0_3, %c0_4] : memref<32x1xf32, #tpu.memory_space<vmem>>, vector<32x1xf32>
    %4 = vector.broadcast %3 : vector<32x1xf32> to vector<32x128xf32>
    %5 = arith.addf %2, %4 : vector<32x128xf32>
    %cst_5 = arith.constant 0.000000e+00 : f32
    %6 = vector.broadcast %cst_5 : f32 to vector<32x128xf32>
    %7 = arith.cmpf oge, %5, %6 : vector<32x128xf32>
    %c0_6 = arith.constant 0 : index
    %c0_7 = arith.constant 0 : index
    %8 = vector.load %arg4[%c0_6, %c0_7] : memref<32x1xf32, #tpu.memory_space<vmem>>, vector<32x1xf32>
    %9 = vector.broadcast %8 : vector<32x1xf32> to vector<32x128xf32>
    %10 = arith.mulf %9, %5 : vector<32x128xf32>
    %11 = arith.select %7, %5, %10 : vector<32x128xi1>, vector<32x128xf32>
    %c0_8 = arith.constant 0 : index
    %c0_9 = arith.constant 0 : index
    %12 = vector.load %arg5[%c0_8, %c0_9] : memref<32x128xf32, #tpu.memory_space<vmem>>, vector<32x128xf32>
    tpu.vector_store %arg5[%c0_8, %c0_9], %11 {strides = array<i32>} : memref<32x128xf32, #tpu.memory_space<vmem>>, vector<32x128xf32>,
    return
  }
  func.func @transform_0(%arg0: i32) -> (i32, i32) {
    %c0_i32 = arith.constant 0 : i32
    %c0_i32_0 = arith.constant 0 : i32
    %c0_i32_1 = arith.constant 0 : i32
    return %c0_i32, %c0_i32_0 : i32, i32
  }
  func.func @transform_1(%arg0: i32) -> (i32, i32) {
    %c0_i32 = arith.constant 0 : i32
    %c0_i32_0 = arith.constant 0 : i32
    return %c0_i32, %arg0 : i32, i32
  }
  func.func @transform_2(%arg0: i32) -> (i32, i32) {
    %c0_i32 = arith.constant 0 : i32
    %c0_i32_0 = arith.constant 0 : i32
    %c0_i32_1 = arith.constant 0 : i32
    return %c0_i32, %c0_i32_0 : i32, i32
  }
  func.func @transform_3(%arg0: i32) -> (i32, i32) {
    %c0_i32 = arith.constant 0 : i32
    %c0_i32_0 = arith.constant 0 : i32
    %c0_i32_1 = arith.constant 0 : i32
    return %c0_i32, %c0_i32_0 : i32, i32
  }
  func.func @transform_4(%arg0: i32) -> (i32, i32) {
    %c0_i32 = arith.constant 0 : i32
    %c0_i32_0 = arith.constant 0 : i32
    return %c0_i32, %arg0 : i32, i32
  }
}

module attributes {stable_mosaic.version = 11 : i64} {
  func.func @_matmul_bias_prelu_kernel(%arg0: i32, %arg1: memref<8x288xbf16, #tpu.memory_space<vmem>>, %arg2: memref<288x128xbf16, #tpu.memory_space<vmem>>, %arg3: memref<8x1xf32, #tpu.memory_space<vmem>>, %arg4: memref<8x1xf32, #tpu.memory_space<vmem>>, %arg5: memref<8x128xf32, #tpu.memory_space<vmem>>) attributes {dimension_semantics = [#tpu.dimension_semantics<parallel>], iteration_bounds = array<i64: 1>, scalar_prefetch = 0 : i64, scratch_operands = 0 : i64, tpu.core_type = #tpu.core_type<tc>, window_params = [{pipeline_mode = #tpu.pipeline_mode<synchronous>, transform_indices = @transform_0, window_bounds = array<i64: 8, 288>}, {transform_indices = @transform_1, window_bounds = array<i64: 288, 128>}, {pipeline_mode = #tpu.pipeline_mode<synchronous>, transform_indices = @transform_2, window_bounds = array<i64: 8, 1>}, {pipeline_mode = #tpu.pipeline_mode<synchronous>, transform_indices = @transform_3, window_bounds = array<i64: 8, 1>}, {transform_indices = @transform_4, window_bounds = array<i64: 8, 128>}]} {
    %c0 = arith.constant 0 : index
    %c0_0 = arith.constant 0 : index
    %0 = vector.load %arg1[%c0, %c0_0] : memref<8x288xbf16, #tpu.memory_space<vmem>>, vector<8x288xbf16>
    %c0_1 = arith.constant 0 : index
    %c0_2 = arith.constant 0 : index
    %1 = vector.load %arg2[%c0_1, %c0_2] : memref<288x128xbf16, #tpu.memory_space<vmem>>, vector<288x128xbf16>
    %cst = arith.constant dense<0.000000e+00> : vector<8x128xf32>
    %2 = tpu.matmul %0, %1, %cst {dimension_numbers = #tpu.dot_dimension_numbers<[1], [0], [0], [1], [0, 0, 1, 1], [], []>} : vector<8x288xbf16>, vector<288x128xbf16>, vector<8x128xf32> -> vector<8x128xf32>
    %c0_3 = arith.constant 0 : index
    %c0_4 = arith.constant 0 : index
    %3 = vector.load %arg3[%c0_3, %c0_4] : memref<8x1xf32, #tpu.memory_space<vmem>>, vector<8x1xf32>
    %4 = vector.broadcast %3 : vector<8x1xf32> to vector<8x128xf32>
    %5 = arith.addf %2, %4 : vector<8x128xf32>
    %cst_5 = arith.constant 0.000000e+00 : f32
    %6 = vector.broadcast %cst_5 : f32 to vector<8x128xf32>
    %7 = arith.cmpf oge, %5, %6 : vector<8x128xf32>
    %c0_6 = arith.constant 0 : index
    %c0_7 = arith.constant 0 : index
    %8 = vector.load %arg4[%c0_6, %c0_7] : memref<8x1xf32, #tpu.memory_space<vmem>>, vector<8x1xf32>
    %9 = vector.broadcast %8 : vector<8x1xf32> to vector<8x128xf32>
    %10 = arith.mulf %9, %5 : vector<8x128xf32>
    %11 = arith.select %7, %5, %10 : vector<8x128xi1>, vector<8x128xf32>
    %c0_8 = arith.constant 0 : index
    %c0_9 = arith.constant 0 : index
    %12 = vector.load %arg5[%c0_8, %c0_9] : memref<8x128xf32, #tpu.memory_space<vmem>>, vector<8x128xf32>
    tpu.vector_store %arg5[%c0_8, %c0_9], %11 {strides = array<i32>} : memref<8x128xf32, #tpu.memory_space<vmem>>, vector<8x128xf32>,
    return
  }
  func.func @transform_0(%arg0: i32) -> (i32, i32) {
    %c0_i32 = arith.constant 0 : i32
    %c0_i32_0 = arith.constant 0 : i32
    %c0_i32_1 = arith.constant 0 : i32
    return %c0_i32, %c0_i32_0 : i32, i32
  }
  func.func @transform_1(%arg0: i32) -> (i32, i32) {
    %c0_i32 = arith.constant 0 : i32
    %c0_i32_0 = arith.constant 0 : i32
    return %c0_i32, %arg0 : i32, i32
  }
  func.func @transform_2(%arg0: i32) -> (i32, i32) {
    %c0_i32 = arith.constant 0 : i32
    %c0_i32_0 = arith.constant 0 : i32
    %c0_i32_1 = arith.constant 0 : i32
    return %c0_i32, %c0_i32_0 : i32, i32
  }
  func.func @transform_3(%arg0: i32) -> (i32, i32) {
    %c0_i32 = arith.constant 0 : i32
    %c0_i32_0 = arith.constant 0 : i32
    %c0_i32_1 = arith.constant 0 : i32
    return %c0_i32, %c0_i32_0 : i32, i32
  }
  func.func @transform_4(%arg0: i32) -> (i32, i32) {
    %c0_i32 = arith.constant 0 : i32
    %c0_i32_0 = arith.constant 0 : i32
    return %c0_i32, %arg0 : i32, i32
  }
}

module attributes {stable_mosaic.version = 11 : i64} {
  func.func @_bilinear_combine_kernel(%arg0: i32, %arg1: memref<16x128xf32, #tpu.memory_space<vmem>>, %arg2: memref<16x128xf32, #tpu.memory_space<vmem>>, %arg3: memref<16x128xf32, #tpu.memory_space<vmem>>, %arg4: memref<16x128xf32, #tpu.memory_space<vmem>>, %arg5: memref<1x128xf32, #tpu.memory_space<vmem>>, %arg6: memref<1x128xf32, #tpu.memory_space<vmem>>, %arg7: memref<1x128xf32, #tpu.memory_space<vmem>>, %arg8: memref<1x128xf32, #tpu.memory_space<vmem>>, %arg9: memref<16x128xf32, #tpu.memory_space<vmem>>) attributes {dimension_semantics = [#tpu.dimension_semantics<parallel>], iteration_bounds = array<i64: 1>, scalar_prefetch = 0 : i64, scratch_operands = 0 : i64, tpu.core_type = #tpu.core_type<tc>, window_params = [{transform_indices = @transform_0, window_bounds = array<i64: 16, 128>}, {transform_indices = @transform_1, window_bounds = array<i64: 16, 128>}, {transform_indices = @transform_2, window_bounds = array<i64: 16, 128>}, {transform_indices = @transform_3, window_bounds = array<i64: 16, 128>}, {transform_indices = @transform_4, window_bounds = array<i64: 1, 128>}, {transform_indices = @transform_5, window_bounds = array<i64: 1, 128>}, {transform_indices = @transform_6, window_bounds = array<i64: 1, 128>}, {transform_indices = @transform_7, window_bounds = array<i64: 1, 128>}, {transform_indices = @transform_8, window_bounds = array<i64: 16, 128>}]} {
    %c0 = arith.constant 0 : index
    %c0_0 = arith.constant 0 : index
    %0 = vector.load %arg5[%c0, %c0_0] : memref<1x128xf32, #tpu.memory_space<vmem>>, vector<1x128xf32>
    %c0_1 = arith.constant 0 : index
    %c0_2 = arith.constant 0 : index
    %1 = vector.load %arg1[%c0_1, %c0_2] : memref<16x128xf32, #tpu.memory_space<vmem>>, vector<16x128xf32>
    %2 = vector.broadcast %0 : vector<1x128xf32> to vector<16x128xf32>
    %3 = arith.mulf %2, %1 : vector<16x128xf32>
    %c0_3 = arith.constant 0 : index
    %c0_4 = arith.constant 0 : index
    %4 = vector.load %arg6[%c0_3, %c0_4] : memref<1x128xf32, #tpu.memory_space<vmem>>, vector<1x128xf32>
    %c0_5 = arith.constant 0 : index
    %c0_6 = arith.constant 0 : index
    %5 = vector.load %arg2[%c0_5, %c0_6] : memref<16x128xf32, #tpu.memory_space<vmem>>, vector<16x128xf32>
    %6 = vector.broadcast %4 : vector<1x128xf32> to vector<16x128xf32>
    %7 = arith.mulf %6, %5 : vector<16x128xf32>
    %8 = arith.addf %3, %7 : vector<16x128xf32>
    %c0_7 = arith.constant 0 : index
    %c0_8 = arith.constant 0 : index
    %9 = vector.load %arg7[%c0_7, %c0_8] : memref<1x128xf32, #tpu.memory_space<vmem>>, vector<1x128xf32>
    %c0_9 = arith.constant 0 : index
    %c0_10 = arith.constant 0 : index
    %10 = vector.load %arg3[%c0_9, %c0_10] : memref<16x128xf32, #tpu.memory_space<vmem>>, vector<16x128xf32>
    %11 = vector.broadcast %9 : vector<1x128xf32> to vector<16x128xf32>
    %12 = arith.mulf %11, %10 : vector<16x128xf32>
    %13 = arith.addf %8, %12 : vector<16x128xf32>
    %c0_11 = arith.constant 0 : index
    %c0_12 = arith.constant 0 : index
    %14 = vector.load %arg8[%c0_11, %c0_12] : memref<1x128xf32, #tpu.memory_space<vmem>>, vector<1x128xf32>
    %c0_13 = arith.constant 0 : index
    %c0_14 = arith.constant 0 : index
    %15 = vector.load %arg4[%c0_13, %c0_14] : memref<16x128xf32, #tpu.memory_space<vmem>>, vector<16x128xf32>
    %16 = vector.broadcast %14 : vector<1x128xf32> to vector<16x128xf32>
    %17 = arith.mulf %16, %15 : vector<16x128xf32>
    %18 = arith.addf %13, %17 : vector<16x128xf32>
    %c0_15 = arith.constant 0 : index
    %c0_16 = arith.constant 0 : index
    %19 = vector.load %arg9[%c0_15, %c0_16] : memref<16x128xf32, #tpu.memory_space<vmem>>, vector<16x128xf32>
    tpu.vector_store %arg9[%c0_15, %c0_16], %18 {strides = array<i32>} : memref<16x128xf32, #tpu.memory_space<vmem>>, vector<16x128xf32>,
    return
  }
  func.func @transform_0(%arg0: i32) -> (i32, i32) {
    %c0_i32 = arith.constant 0 : i32
    %c0_i32_0 = arith.constant 0 : i32
    return %c0_i32, %arg0 : i32, i32
  }
  func.func @transform_1(%arg0: i32) -> (i32, i32) {
    %c0_i32 = arith.constant 0 : i32
    %c0_i32_0 = arith.constant 0 : i32
    return %c0_i32, %arg0 : i32, i32
  }
  func.func @transform_2(%arg0: i32) -> (i32, i32) {
    %c0_i32 = arith.constant 0 : i32
    %c0_i32_0 = arith.constant 0 : i32
    return %c0_i32, %arg0 : i32, i32
  }
  func.func @transform_3(%arg0: i32) -> (i32, i32) {
    %c0_i32 = arith.constant 0 : i32
    %c0_i32_0 = arith.constant 0 : i32
    return %c0_i32, %arg0 : i32, i32
  }
  func.func @transform_4(%arg0: i32) -> (i32, i32) {
    %c0_i32 = arith.constant 0 : i32
    %c0_i32_0 = arith.constant 0 : i32
    return %c0_i32, %arg0 : i32, i32
  }
  func.func @transform_5(%arg0: i32) -> (i32, i32) {
    %c0_i32 = arith.constant 0 : i32
    %c0_i32_0 = arith.constant 0 : i32
    return %c0_i32, %arg0 : i32, i32
  }
  func.func @transform_6(%arg0: i32) -> (i32, i32) {
    %c0_i32 = arith.constant 0 : i32
    %c0_i32_0 = arith.constant 0 : i32
    return %c0_i32, %arg0 : i32, i32
  }
  func.func @transform_7(%arg0: i32) -> (i32, i32) {
    %c0_i32 = arith.constant 0 : i32
    %c0_i32_0 = arith.constant 0 : i32
    return %c0_i32, %arg0 : i32, i32
  }
  func.func @transform_8(%arg0: i32) -> (i32, i32) {
    %c0_i32 = arith.constant 0 : i32
    %c0_i32_0 = arith.constant 0 : i32
    return %c0_i32, %arg0 : i32, i32
  }
}

module attributes {stable_mosaic.version = 11 : i64} {
  func.func @_matmul_bias_prelu_kernel(%arg0: i32, %arg1: memref<8x63xbf16, #tpu.memory_space<vmem>>, %arg2: memref<63x128xbf16, #tpu.memory_space<vmem>>, %arg3: memref<8x1xf32, #tpu.memory_space<vmem>>, %arg4: memref<8x1xf32, #tpu.memory_space<vmem>>, %arg5: memref<8x128xf32, #tpu.memory_space<vmem>>) attributes {dimension_semantics = [#tpu.dimension_semantics<parallel>], iteration_bounds = array<i64: 1>, scalar_prefetch = 0 : i64, scratch_operands = 0 : i64, tpu.core_type = #tpu.core_type<tc>, window_params = [{pipeline_mode = #tpu.pipeline_mode<synchronous>, transform_indices = @transform_0, window_bounds = array<i64: 8, 63>}, {transform_indices = @transform_1, window_bounds = array<i64: 63, 128>}, {pipeline_mode = #tpu.pipeline_mode<synchronous>, transform_indices = @transform_2, window_bounds = array<i64: 8, 1>}, {pipeline_mode = #tpu.pipeline_mode<synchronous>, transform_indices = @transform_3, window_bounds = array<i64: 8, 1>}, {transform_indices = @transform_4, window_bounds = array<i64: 8, 128>}]} {
    %c0 = arith.constant 0 : index
    %c0_0 = arith.constant 0 : index
    %0 = vector.load %arg1[%c0, %c0_0] : memref<8x63xbf16, #tpu.memory_space<vmem>>, vector<8x63xbf16>
    %c0_1 = arith.constant 0 : index
    %c0_2 = arith.constant 0 : index
    %1 = vector.load %arg2[%c0_1, %c0_2] : memref<63x128xbf16, #tpu.memory_space<vmem>>, vector<63x128xbf16>
    %cst = arith.constant dense<0.000000e+00> : vector<8x128xf32>
    %2 = tpu.matmul %0, %1, %cst {dimension_numbers = #tpu.dot_dimension_numbers<[1], [0], [0], [1], [0, 0, 1, 1], [], []>} : vector<8x63xbf16>, vector<63x128xbf16>, vector<8x128xf32> -> vector<8x128xf32>
    %c0_3 = arith.constant 0 : index
    %c0_4 = arith.constant 0 : index
    %3 = vector.load %arg3[%c0_3, %c0_4] : memref<8x1xf32, #tpu.memory_space<vmem>>, vector<8x1xf32>
    %4 = vector.broadcast %3 : vector<8x1xf32> to vector<8x128xf32>
    %5 = arith.addf %2, %4 : vector<8x128xf32>
    %cst_5 = arith.constant 0.000000e+00 : f32
    %6 = vector.broadcast %cst_5 : f32 to vector<8x128xf32>
    %7 = arith.cmpf oge, %5, %6 : vector<8x128xf32>
    %c0_6 = arith.constant 0 : index
    %c0_7 = arith.constant 0 : index
    %8 = vector.load %arg4[%c0_6, %c0_7] : memref<8x1xf32, #tpu.memory_space<vmem>>, vector<8x1xf32>
    %9 = vector.broadcast %8 : vector<8x1xf32> to vector<8x128xf32>
    %10 = arith.mulf %9, %5 : vector<8x128xf32>
    %11 = arith.select %7, %5, %10 : vector<8x128xi1>, vector<8x128xf32>
    %c0_8 = arith.constant 0 : index
    %c0_9 = arith.constant 0 : index
    %12 = vector.load %arg5[%c0_8, %c0_9] : memref<8x128xf32, #tpu.memory_space<vmem>>, vector<8x128xf32>
    tpu.vector_store %arg5[%c0_8, %c0_9], %11 {strides = array<i32>} : memref<8x128xf32, #tpu.memory_space<vmem>>, vector<8x128xf32>,
    return
  }
  func.func @transform_0(%arg0: i32) -> (i32, i32) {
    %c0_i32 = arith.constant 0 : i32
    %c0_i32_0 = arith.constant 0 : i32
    %c0_i32_1 = arith.constant 0 : i32
    return %c0_i32, %c0_i32_0 : i32, i32
  }
  func.func @transform_1(%arg0: i32) -> (i32, i32) {
    %c0_i32 = arith.constant 0 : i32
    %c0_i32_0 = arith.constant 0 : i32
    return %c0_i32, %arg0 : i32, i32
  }
  func.func @transform_2(%arg0: i32) -> (i32, i32) {
    %c0_i32 = arith.constant 0 : i32
    %c0_i32_0 = arith.constant 0 : i32
    %c0_i32_1 = arith.constant 0 : i32
    return %c0_i32, %c0_i32_0 : i32, i32
  }
  func.func @transform_3(%arg0: i32) -> (i32, i32) {
    %c0_i32 = arith.constant 0 : i32
    %c0_i32_0 = arith.constant 0 : i32
    %c0_i32_1 = arith.constant 0 : i32
    return %c0_i32, %c0_i32_0 : i32, i32
  }
  func.func @transform_4(%arg0: i32) -> (i32, i32) {
    %c0_i32 = arith.constant 0 : i32
    %c0_i32_0 = arith.constant 0 : i32
    return %c0_i32, %arg0 : i32, i32
  }
}

module attributes {stable_mosaic.version = 11 : i64} {
  func.func @_matmul_bias_prelu_kernel(%arg0: i32, %arg1: memref<8x72xbf16, #tpu.memory_space<vmem>>, %arg2: memref<72x128xbf16, #tpu.memory_space<vmem>>, %arg3: memref<8x1xf32, #tpu.memory_space<vmem>>, %arg4: memref<8x1xf32, #tpu.memory_space<vmem>>, %arg5: memref<8x128xf32, #tpu.memory_space<vmem>>) attributes {dimension_semantics = [#tpu.dimension_semantics<parallel>], iteration_bounds = array<i64: 1>, scalar_prefetch = 0 : i64, scratch_operands = 0 : i64, tpu.core_type = #tpu.core_type<tc>, window_params = [{pipeline_mode = #tpu.pipeline_mode<synchronous>, transform_indices = @transform_0, window_bounds = array<i64: 8, 72>}, {transform_indices = @transform_1, window_bounds = array<i64: 72, 128>}, {pipeline_mode = #tpu.pipeline_mode<synchronous>, transform_indices = @transform_2, window_bounds = array<i64: 8, 1>}, {pipeline_mode = #tpu.pipeline_mode<synchronous>, transform_indices = @transform_3, window_bounds = array<i64: 8, 1>}, {transform_indices = @transform_4, window_bounds = array<i64: 8, 128>}]} {
    %c0 = arith.constant 0 : index
    %c0_0 = arith.constant 0 : index
    %0 = vector.load %arg1[%c0, %c0_0] : memref<8x72xbf16, #tpu.memory_space<vmem>>, vector<8x72xbf16>
    %c0_1 = arith.constant 0 : index
    %c0_2 = arith.constant 0 : index
    %1 = vector.load %arg2[%c0_1, %c0_2] : memref<72x128xbf16, #tpu.memory_space<vmem>>, vector<72x128xbf16>
    %cst = arith.constant dense<0.000000e+00> : vector<8x128xf32>
    %2 = tpu.matmul %0, %1, %cst {dimension_numbers = #tpu.dot_dimension_numbers<[1], [0], [0], [1], [0, 0, 1, 1], [], []>} : vector<8x72xbf16>, vector<72x128xbf16>, vector<8x128xf32> -> vector<8x128xf32>
    %c0_3 = arith.constant 0 : index
    %c0_4 = arith.constant 0 : index
    %3 = vector.load %arg3[%c0_3, %c0_4] : memref<8x1xf32, #tpu.memory_space<vmem>>, vector<8x1xf32>
    %4 = vector.broadcast %3 : vector<8x1xf32> to vector<8x128xf32>
    %5 = arith.addf %2, %4 : vector<8x128xf32>
    %cst_5 = arith.constant 0.000000e+00 : f32
    %6 = vector.broadcast %cst_5 : f32 to vector<8x128xf32>
    %7 = arith.cmpf oge, %5, %6 : vector<8x128xf32>
    %c0_6 = arith.constant 0 : index
    %c0_7 = arith.constant 0 : index
    %8 = vector.load %arg4[%c0_6, %c0_7] : memref<8x1xf32, #tpu.memory_space<vmem>>, vector<8x1xf32>
    %9 = vector.broadcast %8 : vector<8x1xf32> to vector<8x128xf32>
    %10 = arith.mulf %9, %5 : vector<8x128xf32>
    %11 = arith.select %7, %5, %10 : vector<8x128xi1>, vector<8x128xf32>
    %c0_8 = arith.constant 0 : index
    %c0_9 = arith.constant 0 : index
    %12 = vector.load %arg5[%c0_8, %c0_9] : memref<8x128xf32, #tpu.memory_space<vmem>>, vector<8x128xf32>
    tpu.vector_store %arg5[%c0_8, %c0_9], %11 {strides = array<i32>} : memref<8x128xf32, #tpu.memory_space<vmem>>, vector<8x128xf32>,
    return
  }
  func.func @transform_0(%arg0: i32) -> (i32, i32) {
    %c0_i32 = arith.constant 0 : i32
    %c0_i32_0 = arith.constant 0 : i32
    %c0_i32_1 = arith.constant 0 : i32
    return %c0_i32, %c0_i32_0 : i32, i32
  }
  func.func @transform_1(%arg0: i32) -> (i32, i32) {
    %c0_i32 = arith.constant 0 : i32
    %c0_i32_0 = arith.constant 0 : i32
    return %c0_i32, %arg0 : i32, i32
  }
  func.func @transform_2(%arg0: i32) -> (i32, i32) {
    %c0_i32 = arith.constant 0 : i32
    %c0_i32_0 = arith.constant 0 : i32
    %c0_i32_1 = arith.constant 0 : i32
    return %c0_i32, %c0_i32_0 : i32, i32
  }
  func.func @transform_3(%arg0: i32) -> (i32, i32) {
    %c0_i32 = arith.constant 0 : i32
    %c0_i32_0 = arith.constant 0 : i32
    %c0_i32_1 = arith.constant 0 : i32
    return %c0_i32, %c0_i32_0 : i32, i32
  }
  func.func @transform_4(%arg0: i32) -> (i32, i32) {
    %c0_i32 = arith.constant 0 : i32
    %c0_i32_0 = arith.constant 0 : i32
    return %c0_i32, %arg0 : i32, i32
  }
}

module attributes {stable_mosaic.version = 11 : i64} {
  func.func @_matmul_bias_prelu_kernel(%arg0: i32, %arg1: memref<20x64xbf16, #tpu.memory_space<vmem>>, %arg2: memref<64x256xbf16, #tpu.memory_space<vmem>>, %arg3: memref<20x1xf32, #tpu.memory_space<vmem>>, %arg4: memref<20x1xf32, #tpu.memory_space<vmem>>, %arg5: memref<20x256xf32, #tpu.memory_space<vmem>>) attributes {dimension_semantics = [#tpu.dimension_semantics<parallel>], iteration_bounds = array<i64: 1>, scalar_prefetch = 0 : i64, scratch_operands = 0 : i64, tpu.core_type = #tpu.core_type<tc>, window_params = [{pipeline_mode = #tpu.pipeline_mode<synchronous>, transform_indices = @transform_0, window_bounds = array<i64: 20, 64>}, {transform_indices = @transform_1, window_bounds = array<i64: 64, 256>}, {pipeline_mode = #tpu.pipeline_mode<synchronous>, transform_indices = @transform_2, window_bounds = array<i64: 20, 1>}, {pipeline_mode = #tpu.pipeline_mode<synchronous>, transform_indices = @transform_3, window_bounds = array<i64: 20, 1>}, {transform_indices = @transform_4, window_bounds = array<i64: 20, 256>}]} {
    %c0 = arith.constant 0 : index
    %c0_0 = arith.constant 0 : index
    %0 = vector.load %arg1[%c0, %c0_0] : memref<20x64xbf16, #tpu.memory_space<vmem>>, vector<20x64xbf16>
    %c0_1 = arith.constant 0 : index
    %c0_2 = arith.constant 0 : index
    %1 = vector.load %arg2[%c0_1, %c0_2] : memref<64x256xbf16, #tpu.memory_space<vmem>>, vector<64x256xbf16>
    %cst = arith.constant dense<0.000000e+00> : vector<20x256xf32>
    %2 = tpu.matmul %0, %1, %cst {dimension_numbers = #tpu.dot_dimension_numbers<[1], [0], [0], [1], [0, 0, 1, 1], [], []>} : vector<20x64xbf16>, vector<64x256xbf16>, vector<20x256xf32> -> vector<20x256xf32>
    %c0_3 = arith.constant 0 : index
    %c0_4 = arith.constant 0 : index
    %3 = vector.load %arg3[%c0_3, %c0_4] : memref<20x1xf32, #tpu.memory_space<vmem>>, vector<20x1xf32>
    %4 = vector.broadcast %3 : vector<20x1xf32> to vector<20x256xf32>
    %5 = arith.addf %2, %4 : vector<20x256xf32>
    %cst_5 = arith.constant 0.000000e+00 : f32
    %6 = vector.broadcast %cst_5 : f32 to vector<20x256xf32>
    %7 = arith.cmpf oge, %5, %6 : vector<20x256xf32>
    %c0_6 = arith.constant 0 : index
    %c0_7 = arith.constant 0 : index
    %8 = vector.load %arg4[%c0_6, %c0_7] : memref<20x1xf32, #tpu.memory_space<vmem>>, vector<20x1xf32>
    %9 = vector.broadcast %8 : vector<20x1xf32> to vector<20x256xf32>
    %10 = arith.mulf %9, %5 : vector<20x256xf32>
    %11 = arith.select %7, %5, %10 : vector<20x256xi1>, vector<20x256xf32>
    %c0_8 = arith.constant 0 : index
    %c0_9 = arith.constant 0 : index
    %12 = vector.load %arg5[%c0_8, %c0_9] : memref<20x256xf32, #tpu.memory_space<vmem>>, vector<20x256xf32>
    tpu.vector_store %arg5[%c0_8, %c0_9], %11 {strides = array<i32>} : memref<20x256xf32, #tpu.memory_space<vmem>>, vector<20x256xf32>,
    return
  }
  func.func @transform_0(%arg0: i32) -> (i32, i32) {
    %c0_i32 = arith.constant 0 : i32
    %c0_i32_0 = arith.constant 0 : i32
    %c0_i32_1 = arith.constant 0 : i32
    return %c0_i32, %c0_i32_0 : i32, i32
  }
  func.func @transform_1(%arg0: i32) -> (i32, i32) {
    %c0_i32 = arith.constant 0 : i32
    %c0_i32_0 = arith.constant 0 : i32
    return %c0_i32, %arg0 : i32, i32
  }
  func.func @transform_2(%arg0: i32) -> (i32, i32) {
    %c0_i32 = arith.constant 0 : i32
    %c0_i32_0 = arith.constant 0 : i32
    %c0_i32_1 = arith.constant 0 : i32
    return %c0_i32, %c0_i32_0 : i32, i32
  }
  func.func @transform_3(%arg0: i32) -> (i32, i32) {
    %c0_i32 = arith.constant 0 : i32
    %c0_i32_0 = arith.constant 0 : i32
    %c0_i32_1 = arith.constant 0 : i32
    return %c0_i32, %c0_i32_0 : i32, i32
  }
  func.func @transform_4(%arg0: i32) -> (i32, i32) {
    %c0_i32 = arith.constant 0 : i32
    %c0_i32_0 = arith.constant 0 : i32
    return %c0_i32, %arg0 : i32, i32
  }
}

</mosaic_0001>

<bundles_post_ra>
// kernel: efblock_forward.12
= control target key start
LH: loop header
LB: loop body
LE: loop exit
PB: predicated region body
PF: predicated region fallthrough
CT: control target
= control target key end

     0   :  { %s149_s0 = inlined_call_operand.vmem [shape: f32[6,64], index: 0, kind: input, shape index: {}]   ;;  %s150_s1 = inlined_call_operand.vmem [shape: f32[6,64], index: 1, kind: input, shape index: {}]   ;;  %s151_s2 = inlined_call_operand.vmem [shape: f32[6,64], index: 2, kind: input, shape index: {}]   ;;  %s152_s3 = inlined_call_operand.vmem [shape: f32[6,64], index: 3, kind: input, shape index: {}]   ;;  %s153_s4 = inlined_call_operand.vmem [shape: f32[1,64], index: 4, kind: input, shape index: {}, may-alias: {4,5,6,7}]   ;;  %s154_s5 = inlined_call_operand.vmem [shape: f32[1,64], index: 5, kind: input, shape index: {}, may-alias: {4,5,6,7}]   ;;  %s155_s6 = inlined_call_operand.vmem [shape: f32[1,64], index: 6, kind: input, shape index: {}, may-alias: {4,5,6,7}]   ;;  %s156_s7 = inlined_call_operand.vmem [shape: f32[1,64], index: 7, kind: input, shape index: {}, may-alias: {4,5,6,7}]   ;;  %s157_s8 = inlined_call_operand.vmem [shape: f32[6,64], index: 8, kind: output, shape index: {}]  }
   0x1   :  { %v73_v0 = vld [vmem:[%s153_s4] ss:$0 sm:$0xff] }
   0x2   :  { %v30_v1 = vld [vmem:[%s149_s0] sm:$0x3f] }
   0x3   :  { %v74_v2 = vld [vmem:[%s154_s5] ss:$0 sm:$0xff]  ;;  %v37_v3 = vmul.f32 %v73_v0, %v30_v1 }
   0x4   :  { %v39_v4 = vld [vmem:[%s150_s1] sm:$0x3f] }
   0x5   :  { %v75_v5 = vld [vmem:[%s155_s6] ss:$0 sm:$0xff]  ;;  %v46_v7 = vmul.f32 %v74_v2, %v39_v4 }
   0x6   :  { %v49_v6 = vld [vmem:[%s151_s2] sm:$0x3f] }
   0x7   :  { %v56_v8 = vmul.f32 %v75_v5, %v49_v6  ;;  %v76_v9 = vld [vmem:[%s156_s7] ss:$0 sm:$0xff]  ;;  %v47_v11 = vadd.f32 %v46_v7, %v37_v3 }
   0x8   :  { %v59_v10 = vld [vmem:[%s152_s3] sm:$0x3f] }
   0x9   :  { %v66_v12 = vmul.f32 %v76_v9, %v59_v10  ;;  %v57_v13 = vadd.f32 %v56_v8, %v47_v11 }
   0xb   :  { %v67_v14 = vadd.f32 %v66_v12, %v57_v13 }
   0xd   :  { %68 = vst [vmem:[%s157_s8] sm:$0x3f] %v67_v14 }

// kernel: efblock_forward.13
= control target key start
LH: loop header
LB: loop body
LE: loop exit
PB: predicated region body
PF: predicated region fallthrough
CT: control target
= control target key end

     0   :  { %s149_s0 = inlined_call_operand.vmem [shape: f32[8,64], index: 0, kind: input, shape index: {}]   ;;  %s150_s1 = inlined_call_operand.vmem [shape: f32[8,64], index: 1, kind: input, shape index: {}]   ;;  %s151_s2 = inlined_call_operand.vmem [shape: f32[8,64], index: 2, kind: input, shape index: {}]   ;;  %s152_s3 = inlined_call_operand.vmem [shape: f32[8,64], index: 3, kind: input, shape index: {}]   ;;  %s153_s4 = inlined_call_operand.vmem [shape: f32[1,64], index: 4, kind: input, shape index: {}, may-alias: {4,5,6,7}]   ;;  %s154_s5 = inlined_call_operand.vmem [shape: f32[1,64], index: 5, kind: input, shape index: {}, may-alias: {4,5,6,7}]   ;;  %s155_s6 = inlined_call_operand.vmem [shape: f32[1,64], index: 6, kind: input, shape index: {}, may-alias: {4,5,6,7}]   ;;  %s156_s7 = inlined_call_operand.vmem [shape: f32[1,64], index: 7, kind: input, shape index: {}, may-alias: {4,5,6,7}]   ;;  %s157_s8 = inlined_call_operand.vmem [shape: f32[8,64], index: 8, kind: output, shape index: {}]  }
   0x1   :  { %v73_v0 = vld [vmem:[%s153_s4] ss:$0 sm:$0xff] }
   0x2   :  { %v30_v1 = vld [vmem:[%s149_s0] sm:$0xff] }
   0x3   :  { %v74_v2 = vld [vmem:[%s154_s5] ss:$0 sm:$0xff]  ;;  %v37_v3 = vmul.f32 %v73_v0, %v30_v1 }
   0x4   :  { %v39_v4 = vld [vmem:[%s150_s1] sm:$0xff] }
   0x5   :  { %v75_v5 = vld [vmem:[%s155_s6] ss:$0 sm:$0xff]  ;;  %v46_v7 = vmul.f32 %v74_v2, %v39_v4 }
   0x6   :  { %v49_v6 = vld [vmem:[%s151_s2] sm:$0xff] }
   0x7   :  { %v56_v8 = vmul.f32 %v75_v5, %v49_v6  ;;  %v76_v9 = vld [vmem:[%s156_s7] ss:$0 sm:$0xff]  ;;  %v47_v11 = vadd.f32 %v46_v7, %v37_v3 }
   0x8   :  { %v59_v10 = vld [vmem:[%s152_s3] sm:$0xff] }
   0x9   :  { %v66_v12 = vmul.f32 %v76_v9, %v59_v10  ;;  %v57_v13 = vadd.f32 %v56_v8, %v47_v11 }
   0xb   :  { %v67_v14 = vadd.f32 %v66_v12, %v57_v13 }
   0xd   :  { %68 = vst [vmem:[%s157_s8] sm:$0xff] %v67_v14 }

// kernel: efblock_forward.14
= control target key start
LH: loop header
LB: loop body
LE: loop exit
PB: predicated region body
PF: predicated region fallthrough
CT: control target
= control target key end

     0   :  { %v178_v0 = vmov 0.0   ;;  %vm72_vm0 = vcmask 1046528   ;;  %vm73_vm1 = vcmask 1047552   ;;  %vm179_vm2 = vmmov 0   ;;  %s241_s1 = inlined_call_operand.vmem [shape: bf16[63,32], index: 1, kind: input, shape index: {}]   ;;  %s242_s2 = inlined_call_operand.vmem [shape: f32[16,1], index: 2, kind: input, shape index: {}]   ;;  %s243_s3 = inlined_call_operand.vmem [shape: f32[16,1], index: 3, kind: input, shape index: {}]   ;;  %s244_s0 = inlined_call_operand.vmem [shape: bf16[16,63], index: 0, kind: input, shape index: {}]   ;;  %s245_s4 = inlined_call_operand.vmem [shape: f32[16,32], index: 4, kind: output, shape index: {}]  }
   0x1   :  { %155 = vmatprep.subr.bf16.mxu0 %v178_v0  ;;  %v173_v1 = vld [vmem:[%s241_s1] sm:$0xff]   ;;  %v174_v2 = vld [vmem:[%s241_s1 + $0x8] sm:$0xff]   ;;  %163 = vmatprep.mubr.msk.bf16.mxu0 %vm179_vm2, %v178_v0  ;;  %v180_v3 = vmov 65535   ;;  %v181_v5 = vmov 0   ;;  %v175_v8 = vld [vmem:[%s241_s1 + $0x10] sm:$0xff]   ;;  %vm68_vm3 = vcmask 515072  }
   0x2   :  { %156 = vmatpush3.bf16.msra.mxu0 %v173_v1  ;;  %v74_v4 = vsel %vm72_vm0, 4294967295, %v180_v3  ;;  %171 = vset.pattern.permute.xlu0 %v181_v5  ;;  %v28_v6 = vld [vmem:[%s242_s2] sm:$0xff]  ;;  %v176_v9 = vld [vmem:[%s241_s1 + $0x18] sm:$0xff]   ;;  %v29_v11 = vld [vmem:[%s242_s2 + $0x8] sm:$0xff] }
   0x3   :  { %157 = vmatprep.subr.bf16.mxu0 %v178_v0  ;;  %172 = vset.pattern.permute.xlu1 %v181_v5  ;;  %v122_v7 = vld [vmem:[%s243_s3] sm:$0xff]  ;;  %v75_v10 = vsel %vm73_vm1, %v74_v4, 0  ;;  %v123_v12 = vld [vmem:[%s243_s3 + $0x8] sm:$0xff] }
   0x4   :  { %32 = vperm.xlu0 %171, %v28_v6   ;;  %126 = vperm.xlu1 %172, %v122_v7   ;;  %v77_v13 = vand.u32 %v176_v9, %v75_v10  ;;  %v177_v14 = vld [vmem:[%s244_s0] sm:$0xff]  }
   0x6   :  { %158 = vmatpush3.bf16.msra.mxu0 %v174_v2 }
   0x7   :  { %159 = vmatprep.subr.bf16.mxu0 %v178_v0 }
   0x8   :  { %37 = vperm.xlu0 %171, %v29_v11   ;;  %131 = vperm.xlu1 %172, %v123_v12  }
   0xa   :  { %160 = vmatpush3.bf16.msra.mxu0 %v175_v8 }
   0xb   :  { %161 = vmatprep.subr.bf16.mxu0 %v178_v0 }
   0xe   :  { %162 = vmatpush3.bf16.msra.mxu0 %v77_v13 }
  0x11   :  { %164 = vmatmul.mubr.msk.bf16.vlgmr.msra.gmra.mrb[0].mxu0 %vm68_vm3, %v177_v14 }
  0x83   :  { %v33_v15 = vpop.permute.xlu0 %32  ;;  %v127_v16 = vpop.permute.xlu1 %126 }
  0x87   :  { %v38_v20 = vpop.permute.xlu0 %37  ;;  %v132_v25 = vpop.permute.xlu1 %131 }
  0xe4   :  { %v113_v17 = vpop.f32.mrb[0].mxu0 }
  0xe5   :  { %v114_v18 = vadd.f32 %v113_v17, %v33_v15  ;;  %v165_v19 = vpop.f32.mrb[1].mxu0 }
  0xe6   :  { %v116_v21 = vpop.f32.mrb[2].mxu0 }
  0xe7   :  { %vm120_vm4 = vcmp.ge.f32.partialorder %v114_v18, 0.0  ;;  %v134_v22 = vmul.f32 %v127_v16, %v114_v18  ;;  %v117_v23 = vadd.f32 %v116_v21, %v38_v20  ;;  %v166_v24 = vpop.f32.mrb[3].mxu0 }
  0xe9   :  { %v136_v26 = vsel %vm120_vm4, %v114_v18, %v134_v22  ;;  %vm121_vm5 = vcmp.ge.f32.partialorder %v117_v23, 0.0  ;;  %v135_v27 = vmul.f32 %v132_v25, %v117_v23 }
  0xea   :  { %138 = vst [vmem:[%s245_s4] sm:$0xff] %v136_v26 }
  0xeb   :  { %v137_v28 = vsel %vm121_vm5, %v117_v23, %v135_v27 }
  0xec   :  { %139 = vst [vmem:[%s245_s4 + $0x8] sm:$0xff] %v137_v28 }

// kernel: efblock_forward.15
= control target key start
LH: loop header
LB: loop body
LE: loop exit
PB: predicated region body
PF: predicated region fallthrough
CT: control target
= control target key end

     0   :  { %v287_v0 = vmov 0   ;;  %vm136_vm0 = vcmask 130048   ;;  %s408_s1 = inlined_call_operand.vmem [shape: bf16[144,8], index: 1, kind: input, shape index: {}]   ;;  %s409_s0 = inlined_call_operand.vmem [shape: bf16[32,144], index: 0, kind: input, shape index: {}]   ;;  %s410_s2 = inlined_call_operand.vmem [shape: f32[32,1], index: 2, kind: input, shape index: {}]   ;;  %s411_s3 = inlined_call_operand.vmem [shape: f32[32,1], index: 3, kind: input, shape index: {}]   ;;  %s412_s4 = inlined_call_operand.vmem [shape: f32[32,8], index: 4, kind: output, shape index: {}]  }
   0x1   :  { %143 = vmatprep.subr.bf16.mxu0 %v287_v0  ;;  %251 = vmatprep.subr.bf16.mxu1 %v287_v0  ;;  %v272_v1 = vld [vmem:[%s408_s1] sm:$0xff]   ;;  %v273_v2 = vld [vmem:[%s408_s1 + $0x8] sm:$0xff]   ;;  %v274_v3 = vld [vmem:[%s408_s1 + $0x10] sm:$0xff]  }
   0x2   :  { %271 = vset.pattern.permute.xlu1 %v287_v0  ;;  %270 = vset.pattern.permute.xlu0 %v287_v0  ;;  %v275_v4 = vld [vmem:[%s408_s1 + $0x18] sm:$0xff]   ;;  %v283_v5 = vld [vmem:[%s409_s0 + $0x4] ss:$8 sps:$4 sm:$0xff]   ;;  %v42_v7 = vld [vmem:[%s410_s2 + $0x10] sm:$0xff] }
   0x3   :  { %144 = vmatpush1.bf16.msra.mxu0 %v272_v1  ;;  %260 = vmatpush1.bf16.msra.mxu1 %v272_v1  ;;  %v286_v6 = vld [vmem:[%s409_s0 + $0x14] ss:$8 sps:$4 sm:$0xff]   ;;  %v40_v8 = vld [vmem:[%s410_s2] sm:$0xff]  ;;  %v41_v11 = vld [vmem:[%s410_s2 + $0x8] sm:$0xff] }
   0x4   :  { %145 = vmatprep.subr.bf16.mxu0 %v287_v0  ;;  %252 = vmatprep.subr.bf16.mxu1 %v287_v0  ;;  %v43_v9 = vld [vmem:[%s410_s2 + $0x18] sm:$0xff]  ;;  %v276_v10 = vld [vmem:[%s408_s1 + $0x20] sm:$0xff]   ;;  %v197_v12 = vld [vmem:[%s411_s3 + $0x8] sm:$0xff] }
   0x5   :  { %249 = vmatprep.mubr.msk.bf16.mxu0 %vm136_vm0, %v283_v5  ;;  %56 = vperm.xlu1 %271, %v42_v7   ;;  %v277_v13 = vld [vmem:[%s408_s1 + $0x28] sm:$0xff]   ;;  %v196_v14 = vld [vmem:[%s411_s3] sm:$0xff]  ;;  %v199_v15 = vld [vmem:[%s411_s3 + $0x18] sm:$0xff] }
   0x6   :  { %250 = vmatprep.mubr.msk.bf16.mxu1 %vm136_vm0, %v286_v6  ;;  %46 = vperm.xlu0 %270, %v40_v8   ;;  %v278_v16 = vld [vmem:[%s408_s1 + $0x30] sm:$0xff]   ;;  %v279_v18 = vld [vmem:[%s408_s1 + $0x38] sm:$0xff]   ;;  %v280_v19 = vld [vmem:[%s408_s1 + $0x40] sm:$0xff]  }
   0x7   :  { %146 = vmatpush1.bf16.msra.mxu0 %v273_v2  ;;  %261 = vmatpush1.bf16.msra.mxu1 %v273_v2  ;;  %v198_v17 = vld [vmem:[%s411_s3 + $0x10] sm:$0xff]  ;;  %v281_v20 = vld [vmem:[%s409_s0] ss:$8 sps:$4 sm:$0xff]  }
   0x8   :  { %147 = vmatprep.subr.bf16.mxu0 %v287_v0  ;;  %253 = vmatprep.subr.bf16.mxu1 %v287_v0  ;;  %v284_v21 = vld [vmem:[%s409_s0 + $0x10] ss:$8 sps:$4 sm:$0xff]  }
   0x9   :  { %61 = vperm.xlu1 %271, %v43_v9  }
   0xa   :  { %51 = vperm.xlu0 %270, %v41_v11  }
   0xb   :  { %148 = vmatpush1.bf16.msra.mxu0 %v274_v3  ;;  %262 = vmatpush1.bf16.msra.mxu1 %v274_v3 }
   0xc   :  { %149 = vmatprep.subr.bf16.mxu0 %v287_v0  ;;  %254 = vmatprep.subr.bf16.mxu1 %v287_v0 }
   0xd   :  { %207 = vperm.xlu1 %271, %v197_v12  }
   0xe   :  { %202 = vperm.xlu0 %270, %v196_v14  }
   0xf   :  { %150 = vmatpush1.bf16.msra.mxu0 %v275_v4  ;;  %263 = vmatpush1.bf16.msra.mxu1 %v275_v4 }
  0x10   :  { %151 = vmatprep.subr.bf16.mxu0 %v287_v0  ;;  %255 = vmatprep.subr.bf16.mxu1 %v287_v0 }
  0x11   :  { %217 = vperm.xlu1 %271, %v199_v15  }
  0x12   :  { %212 = vperm.xlu0 %270, %v198_v17  }
  0x13   :  { %152 = vmatpush1.bf16.msra.mxu0 %v276_v10  ;;  %264 = vmatpush1.bf16.msra.mxu1 %v276_v10 }
  0x14   :  { %153 = vmatprep.subr.bf16.mxu0 %v287_v0  ;;  %256 = vmatprep.subr.bf16.mxu1 %v287_v0 }
  0x17   :  { %154 = vmatpush1.bf16.msra.mxu0 %v277_v13  ;;  %265 = vmatpush1.bf16.msra.mxu1 %v277_v13 }
  0x18   :  { %155 = vmatprep.subr.bf16.mxu0 %v287_v0  ;;  %257 = vmatprep.subr.bf16.mxu1 %v287_v0 }
  0x1b   :  { %156 = vmatpush1.bf16.msra.mxu0 %v278_v16  ;;  %266 = vmatpush1.bf16.msra.mxu1 %v278_v16 }
  0x1c   :  { %157 = vmatprep.subr.bf16.mxu0 %v287_v0  ;;  %258 = vmatprep.subr.bf16.mxu1 %v287_v0 }
  0x1f   :  { %158 = vmatpush1.bf16.msra.mxu0 %v279_v18  ;;  %267 = vmatpush1.bf16.msra.mxu1 %v279_v18 }
  0x20   :  { %159 = vmatprep.subr.bf16.mxu0 %v287_v0  ;;  %259 = vmatprep.subr.bf16.mxu1 %v287_v0 }
  0x23   :  { %160 = vmatpush1.bf16.msra.mxu0 %v280_v19  ;;  %268 = vmatpush1.bf16.msra.mxu1 %v280_v19 }
  0x26   :  { %176 = vmatmul.mubr.bf16.vlgmr.msra.gmra.mrb[0].mxu0 %v281_v20  ;;  %184 = vmatmul.mubr.bf16.vlgmr.msra.gmra.mrb[0].mxu1 %v284_v21 }
  0x84   :  { %v57_v23 = vpop.permute.xlu1 %56 }
  0x85   :  { %v47_v22 = vpop.permute.xlu0 %46 }
  0x88   :  { %v62_v25 = vpop.permute.xlu1 %61 }
  0x89   :  { %v52_v24 = vpop.permute.xlu0 %51 }
  0x8c   :  { %v208_v27 = vpop.permute.xlu1 %207 }
  0x8d   :  { %v203_v26 = vpop.permute.xlu0 %202 }
  0x90   :  { %v218_v43 = vpop.permute.xlu1 %217 }
  0x91   :  { %v213_v28 = vpop.permute.xlu0 %212 }
  0xf9   :  { %v177_v29 = vpop.f32.mrb[0].mxu0  ;;  %v185_v30 = vpop.f32.mrb[0].mxu1 }
  0xfa   :  { %v178_v31 = vadd.f32 %v177_v29, %v47_v22  ;;  %v186_v32 = vadd.f32 %v185_v30, %v57_v23  ;;  %v179_v33 = vpop.f32.mrb[1].mxu0  ;;  %v187_v34 = vpop.f32.mrb[1].mxu1 }
  0xfb   :  { %v180_v35 = vpop.f32.mrb[2].mxu0  ;;  %v188_v36 = vpop.f32.mrb[2].mxu1 }
  0xfc   :  { %vm192_vm1 = vcmp.ge.f32.partialorder %v178_v31, 0.0  ;;  %v220_v37 = vmul.f32 %v203_v26, %v178_v31  ;;  %vm194_vm2 = vcmp.ge.f32.partialorder %v186_v32, 0.0  ;;  %v222_v38 = vmul.f32 %v213_v28, %v186_v32  ;;  %v182_v39 = vpop.f32.mrb[3].mxu0  ;;  %v190_v40 = vpop.f32.mrb[3].mxu1 }
  0xfd   :  { %v181_v41 = vadd.f32 %v180_v35, %v52_v24  ;;  %v189_v42 = vadd.f32 %v188_v36, %v62_v25 }
  0xfe   :  { %v224_v44 = vsel %vm192_vm1, %v178_v31, %v220_v37  ;;  %v226_v45 = vsel %vm194_vm2, %v186_v32, %v222_v38 }
  0xff   :  { %228 = vst [vmem:[%s412_s4] sm:$0xff] %v224_v44  ;;  %230 = vst [vmem:[%s412_s4 + $0x10] sm:$0xff] %v226_v45  ;;  %vm193_vm3 = vcmp.ge.f32.partialorder %v181_v41, 0.0  ;;  %v221_v46 = vmul.f32 %v208_v27, %v181_v41  ;;  %vm195_vm4 = vcmp.ge.f32.partialorder %v189_v42, 0.0  ;;  %v223_v47 = vmul.f32 %v218_v43, %v189_v42 }
 0x101   :  { %v225_v48 = vsel %vm193_vm3, %v181_v41, %v221_v46  ;;  %v227_v49 = vsel %vm195_vm4, %v189_v42, %v223_v47 }
 0x102   :  { %229 = vst [vmem:[%s412_s4 + $0x8] sm:$0xff] %v225_v48  ;;  %231 = vst [vmem:[%s412_s4 + $0x18] sm:$0xff] %v227_v49 }

// kernel: efblock_forward.16
= control target key start
LH: loop header
LB: loop body
LE: loop exit
PB: predicated region body
PF: predicated region fallthrough
CT: control target
= control target key end

     0   :  { %v468_v1 = vmov 0   ;;  %vm224_vm0 = vcmask 261120   ;;  %s604_s1 = inlined_call_operand.vmem [shape: bf16[288,8], index: 1, kind: input, shape index: {}]   ;;  %s605_s0 = inlined_call_operand.vmem [shape: bf16[32,288], index: 0, kind: input, shape index: {}]   ;;  %s606_s2 = inlined_call_operand.vmem [shape: f32[32,1], index: 2, kind: input, shape index: {}]   ;;  %s607_s3 = inlined_call_operand.vmem [shape: f32[32,1], index: 3, kind: input, shape index: {}]   ;;  %s608_s4 = inlined_call_operand.vmem [shape: f32[32,8], index: 4, kind: output, shape index: {}]  }
   0x1   :  { %v442_v0 = vld [vmem:[%s604_s1 + $0x40] sm:$0xff]   ;;  %441 = vset.pattern.permute.xlu1 %v468_v1  ;;  %440 = vset.pattern.permute.xlu0 %v468_v1  ;;  %v444_v3 = vld [vmem:[%s604_s1 + $0x48] sm:$0xff]   ;;  %v446_v5 = vld [vmem:[%s604_s1 + $0x50] sm:$0xff]  }
   0x2   :  { %v443_v2 = vld [vmem:[%s604_s1] sm:$0xff]   ;;  %399 = vmatprep.subr.bf16.mxu0 %v442_v0  ;;  %v445_v4 = vld [vmem:[%s604_s1 + $0x8] sm:$0xff]   ;;  %v447_v6 = vld [vmem:[%s604_s1 + $0x10] sm:$0xff]  }
   0x3   :  { %400 = vmatpush3.bf16.msra.mxu0 %v443_v2  ;;  %v448_v7 = vld [vmem:[%s604_s1 + $0x58] sm:$0xff]   ;;  %v450_v9 = vld [vmem:[%s604_s1 + $0x60] sm:$0xff]   ;;  %v452_v12 = vld [vmem:[%s604_s1 + $0x68] sm:$0xff]  }
   0x4   :  { %401 = vmatprep.subr.bf16.mxu0 %v444_v3  ;;  %v449_v8 = vld [vmem:[%s604_s1 + $0x18] sm:$0xff]   ;;  %v451_v10 = vld [vmem:[%s604_s1 + $0x20] sm:$0xff]   ;;  %v453_v13 = vld [vmem:[%s604_s1 + $0x28] sm:$0xff]  }
   0x5   :  { %v457_v11 = vld [vmem:[%s604_s1 + $0x80] sm:$0xff]   ;;  %v454_v14 = vld [vmem:[%s604_s1 + $0x70] sm:$0xff]   ;;  %v462_v16 = vld [vmem:[%s604_s1 + $0x88] sm:$0xff]  }
   0x6   :  { %431 = vmatprep.subr.bf16.mxu1 %v457_v11  ;;  %v461_v15 = vld [vmem:[%s605_s0 + $0x4] ss:$12 sps:$4 sm:$0xff]   ;;  %v463_v17 = vld [vmem:[%s605_s0 + $0x8] ss:$12 sps:$4 sm:$0xff]   ;;  %v464_v18 = vld [vmem:[%s605_s0 + $0x20] ss:$12 sps:$4 sm:$0xff]  }
   0x7   :  { %402 = vmatpush3.bf16.msra.mxu0 %v445_v4  ;;  %432 = vmatpush3.bf16.msra.mxu1 %v457_v11  ;;  %v64_v19 = vld [vmem:[%s606_s2 + $0x10] sm:$0xff]  ;;  %v62_v21 = vld [vmem:[%s606_s2] sm:$0xff]  ;;  %v456_v22 = vld [vmem:[%s604_s1 + $0x78] sm:$0xff]  }
   0x8   :  { %403 = vmatprep.subr.bf16.mxu0 %v446_v5  ;;  %263 = vmatprep.mubr.bf16.mxu0 %v461_v15  ;;  %v455_v20 = vld [vmem:[%s604_s1 + $0x30] sm:$0xff]   ;;  %v65_v23 = vld [vmem:[%s606_s2 + $0x18] sm:$0xff]  ;;  %v63_v24 = vld [vmem:[%s606_s2 + $0x8] sm:$0xff] }
   0x9   :  { %433 = vmatprep.subr.bf16.mxu1 %v462_v16  ;;  %435 = vmatprep.mubr.msk.bf16.mxu1 %vm224_vm0, %v463_v17  ;;  %v458_v25 = vld [vmem:[%s604_s1 + $0x38] sm:$0xff]   ;;  %v334_v26 = vld [vmem:[%s607_s3 + $0x8] sm:$0xff]  ;;  %v333_v27 = vld [vmem:[%s607_s3] sm:$0xff] }
   0xa   :  { %78 = vperm.xlu1 %441, %v64_v19   ;;  %68 = vperm.xlu0 %440, %v62_v21   ;;  %v459_v28 = vld [vmem:[%s605_s0] ss:$12 sps:$4 sm:$0xff]   ;;  %v465_v29 = vld [vmem:[%s605_s0 + $0x1c] ss:$12 sps:$4 sm:$0xff]   ;;  %v335_v31 = vld [vmem:[%s607_s3 + $0x10] sm:$0xff] }
   0xb   :  { %404 = vmatpush3.bf16.msra.mxu0 %v447_v6  ;;  %434 = vmatpush3.bf16.msra.mxu1 %v462_v16  ;;  %v336_v30 = vld [vmem:[%s607_s3 + $0x18] sm:$0xff] }
   0xc   :  { %405 = vmatprep.subr.bf16.mxu0 %v448_v7  ;;  %v467_v32 = vld [vmem:[%s605_s0 + $0x18] ss:$12 sps:$4 sm:$0xff]  }
   0xe   :  { %436 = vmatmul.mubr.msk.bf16.vlgmr.msra.gmra.mrb[0].mxu1 %vm224_vm0, %v464_v18  ;;  %83 = vperm.xlu1 %441, %v65_v23  }
   0xf   :  { %406 = vmatpush3.bf16.msra.mxu0 %v449_v8  ;;  %73 = vperm.xlu0 %440, %v63_v24  }
  0x10   :  { %407 = vmatprep.subr.bf16.mxu0 %v450_v9 }
  0x12   :  { %344 = vperm.xlu1 %441, %v334_v26  }
  0x13   :  { %408 = vmatpush3.bf16.msra.mxu0 %v451_v10  ;;  %339 = vperm.xlu0 %440, %v333_v27  }
  0x14   :  { %409 = vmatprep.subr.bf16.mxu0 %v452_v12 }
  0x16   :  { %354 = vperm.xlu1 %441, %v336_v30  }
  0x17   :  { %410 = vmatpush3.bf16.msra.mxu0 %v453_v13  ;;  %349 = vperm.xlu0 %440, %v335_v31  }
  0x18   :  { %411 = vmatprep.subr.bf16.mxu0 %v454_v14 }
  0x1b   :  { %412 = vmatpush3.bf16.msra.mxu0 %v455_v20 }
  0x1c   :  { %413 = vmatprep.subr.bf16.mxu0 %v456_v22 }
  0x1f   :  { %414 = vmatpush3.bf16.msra.mxu0 %v458_v25 }
  0x22   :  { %264 = vmatmul.mubr.bf16.vlgmr.msra.gmra.mrb[0].mxu0 %v459_v28 }
  0x23   :  { %271 = vmatprep.mubr.bf16.mxu0 %v465_v29 }
  0x2a   :  { %272 = vmatmul.mubr.bf16.gmra.mrb[4].mxu0 %v467_v32 }
  0x89   :  { %v69_v37 = vpop.permute.xlu0 %68  ;;  %v79_v38 = vpop.permute.xlu1 %78 }
  0x8d   :  { %v84_v44 = vpop.permute.xlu1 %83 }
  0x8e   :  { %v74_v40 = vpop.permute.xlu0 %73 }
  0x91   :  { %v345_v54 = vpop.permute.xlu1 %344 }
  0x92   :  { %v340_v50 = vpop.permute.xlu0 %339 }
  0x95   :  { %v355_v5 = vpop.permute.xlu1 %354 }
  0x96   :  { %v350_v2 = vpop.permute.xlu0 %349 }
  0xe1   :  { %v437_v33 = vpop.f32.mrb[0].mxu1 }
  0xe2   :  { %v314_v34 = vpop.f32.mrb[1].mxu1 }
  0xe3   :  { %v438_v35 = vpop.f32.mrb[2].mxu1 }
  0xe4   :  { %v317_v36 = vpop.f32.mrb[3].mxu1 }
  0xf5   :  { %v415_v39 = vpop.f32.mrb[0].mxu0 }
  0xf6   :  { %v416_v41 = vpop.f32.mrb[1].mxu0 }
  0xf7   :  { %v417_v42 = vadd.f32 %v416_v41, %v415_v39  ;;  %v418_v43 = vpop.f32.mrb[2].mxu0 }
  0xf8   :  { %v419_v45 = vpop.f32.mrb[3].mxu0 }
  0xf9   :  { %v420_v46 = vadd.f32 %v419_v45, %v418_v43  ;;  %v266_v47 = vadd.f32 %v417_v42, %v69_v37 }
  0xfb   :  { %v315_v48 = vadd.f32 %v314_v34, %v266_v47  ;;  %v269_v49 = vadd.f32 %v420_v46, %v74_v40 }
  0xfd   :  { %vm329_vm1 = vcmp.ge.f32.partialorder %v315_v48, 0.0  ;;  %v357_v51 = vmul.f32 %v340_v50, %v315_v48  ;;  %v318_v52 = vadd.f32 %v317_v36, %v269_v49  ;;  %v421_v53 = vpop.f32.mrb[4].mxu0 }
  0xfe   :  { %v422_v55 = vpop.f32.mrb[5].mxu0 }
  0xff   :  { %v361_v56 = vsel %vm329_vm1, %v315_v48, %v357_v51  ;;  %vm330_vm2 = vcmp.ge.f32.partialorder %v318_v52, 0.0  ;;  %v358_v57 = vmul.f32 %v345_v54, %v318_v52  ;;  %v423_v58 = vadd.f32 %v422_v55, %v421_v53  ;;  %v424_v59 = vpop.f32.mrb[6].mxu0 }
 0x100   :  { %365 = vst [vmem:[%s608_s4] sm:$0xff] %v361_v56  ;;  %v425_v60 = vpop.f32.mrb[7].mxu0 }
 0x101   :  { %v362_v61 = vsel %vm330_vm2, %v318_v52, %v358_v57  ;;  %v274_v62 = vadd.f32 %v423_v58, %v79_v38  ;;  %v426_v63 = vadd.f32 %v425_v60, %v424_v59 }
 0x102   :  { %366 = vst [vmem:[%s608_s4 + $0x8] sm:$0xff] %v362_v61 }
 0x103   :  { %v323_v0 = vadd.f32 %v437_v33, %v274_v62  ;;  %v277_v1 = vadd.f32 %v426_v63, %v84_v44 }
 0x105   :  { %vm331_vm3 = vcmp.ge.f32.partialorder %v323_v0, 0.0  ;;  %v359_v3 = vmul.f32 %v350_v2, %v323_v0  ;;  %v326_v4 = vadd.f32 %v438_v35, %v277_v1 }
 0x107   :  { %v363_v6 = vsel %vm331_vm3, %v323_v0, %v359_v3  ;;  %vm332_vm4 = vcmp.ge.f32.partialorder %v326_v4, 0.0  ;;  %v360_v7 = vmul.f32 %v355_v5, %v326_v4 }
 0x108   :  { %367 = vst [vmem:[%s608_s4 + $0x10] sm:$0xff] %v363_v6 }
 0x109   :  { %v364_v8 = vsel %vm332_vm4, %v326_v4, %v360_v7 }
 0x10a   :  { %368 = vst [vmem:[%s608_s4 + $0x18] sm:$0xff] %v364_v8 }

// kernel: efblock_forward.19
= control target key start
LH: loop header
LB: loop body
LE: loop exit
PB: predicated region body
PF: predicated region fallthrough
CT: control target
= control target key end

     0   :  { %v358_v1 = vmov 0.0   ;;  %vm359_vm0 = vmmov 0   ;;  %v360_v3 = vmov 0   ;;  %vm180_vm1 = vcmask 261120   ;;  %s455_s1 = inlined_call_operand.vmem [shape: bf16[288,8], index: 1, kind: input, shape index: {}]   ;;  %s456_s0 = inlined_call_operand.vmem [shape: bf16[8,288], index: 0, kind: input, shape index: {}]   ;;  %s457_s2 = inlined_call_operand.vmem [shape: f32[8,1], index: 2, kind: input, shape index: {}]   ;;  %s458_s3 = inlined_call_operand.vmem [shape: f32[8,1], index: 3, kind: input, shape index: {}]   ;;  %s459_s4 = inlined_call_operand.vmem [shape: f32[8,8], index: 4, kind: output, shape index: {}]  }
   0x1   :  { %v337_v0 = vld [vmem:[%s455_s1 + $0x40] sm:$0xff]   ;;  %325 = vmatprep.subr.bf16.mxu1 %v358_v1  ;;  %329 = vmatprep.mubr.msk.bf16.mxu1 %vm359_vm0, %v358_v1  ;;  %v339_v4 = vld [vmem:[%s455_s1 + $0x48] sm:$0xff]   ;;  %v341_v6 = vld [vmem:[%s455_s1 + $0x50] sm:$0xff]  }
   0x2   :  { %v338_v2 = vld [vmem:[%s455_s1] sm:$0xff]   ;;  %336 = vset.pattern.permute.xlu0 %v360_v3  ;;  %300 = vmatprep.subr.bf16.mxu0 %v337_v0  ;;  %v340_v5 = vld [vmem:[%s455_s1 + $0x8] sm:$0xff]   ;;  %v342_v7 = vld [vmem:[%s455_s1 + $0x10] sm:$0xff]  }
   0x3   :  { %301 = vmatpush3.bf16.msra.mxu0 %v338_v2  ;;  %v343_v8 = vld [vmem:[%s455_s1 + $0x58] sm:$0xff]   ;;  %v345_v10 = vld [vmem:[%s455_s1 + $0x60] sm:$0xff]   ;;  %v347_v13 = vld [vmem:[%s455_s1 + $0x68] sm:$0xff]  }
   0x4   :  { %302 = vmatprep.subr.bf16.mxu0 %v339_v4  ;;  %v344_v9 = vld [vmem:[%s455_s1 + $0x18] sm:$0xff]   ;;  %v351_v11 = vld [vmem:[%s455_s1 + $0x80] sm:$0xff]   ;;  %v357_v16 = vld [vmem:[%s455_s1 + $0x88] sm:$0xff]  }
   0x5   :  { %v346_v12 = vld [vmem:[%s455_s1 + $0x20] sm:$0xff]   ;;  %326 = vmatpush3.bf16.msra.mxu1 %v351_v11  ;;  %v348_v17 = vld [vmem:[%s455_s1 + $0x28] sm:$0xff]   ;;  %v349_v19 = vld [vmem:[%s455_s1 + $0x70] sm:$0xff]  }
   0x6   :  { %327 = vmatprep.subr.bf16.mxu1 %v358_v1  ;;  %v18_v14 = vld [vmem:[%s456_s0] sm:$0xff]  ;;  %v356_v20 = vld [vmem:[%s456_s0 + $0x8] ss:$0 sps:$4 sm:$0xff]   ;;  %v350_v22 = vld [vmem:[%s455_s1 + $0x30] sm:$0xff]  }
   0x7   :  { %303 = vmatpush3.bf16.msra.mxu0 %v340_v5  ;;  %v279_v15 = vcombine.high %v18_v14, %v18_v14  ;;  %v56_v18 = vld [vmem:[%s457_s2] sm:$0xff]  ;;  %v352_v23 = vld [vmem:[%s455_s1 + $0x78] sm:$0xff]   ;;  %v278_v25 = vcombine.low %v18_v14, %v18_v14 }
   0x8   :  { %304 = vmatprep.subr.bf16.mxu0 %v341_v6  ;;  %59 = vperm.xlu0 %336, %v56_v18   ;;  %v265_v21 = vld [vmem:[%s458_s3] sm:$0xff]  ;;  %v353_v24 = vld [vmem:[%s455_s1 + $0x38] sm:$0xff]  }
   0x9   :  { %216 = vmatprep.mubr.bf16.mxu0 %v279_v15  ;;  %328 = vmatpush3.bf16.msra.mxu1 %v357_v16 }
   0xb   :  { %305 = vmatpush3.bf16.msra.mxu0 %v342_v7 }
   0xc   :  { %306 = vmatprep.subr.bf16.mxu0 %v343_v8  ;;  %330 = vmatmul.mubr.msk.bf16.vlgmr.msra.gmra.mrb[0].mxu1 %vm180_vm1, %v356_v20 }
   0xd   :  { %268 = vperm.xlu0 %336, %v265_v21  }
   0xf   :  { %307 = vmatpush3.bf16.msra.mxu0 %v344_v9 }
  0x10   :  { %308 = vmatprep.subr.bf16.mxu0 %v345_v10 }
  0x13   :  { %309 = vmatpush3.bf16.msra.mxu0 %v346_v12 }
  0x14   :  { %310 = vmatprep.subr.bf16.mxu0 %v347_v13 }
  0x17   :  { %311 = vmatpush3.bf16.msra.mxu0 %v348_v17 }
  0x18   :  { %312 = vmatprep.subr.bf16.mxu0 %v349_v19 }
  0x1b   :  { %313 = vmatpush3.bf16.msra.mxu0 %v350_v22 }
  0x1c   :  { %314 = vmatprep.subr.bf16.mxu0 %v352_v23 }
  0x1f   :  { %315 = vmatpush3.bf16.msra.mxu0 %v353_v24 }
  0x22   :  { %217 = vmatmul.mubr.bf16.vlgmr.msra.gmra.mrb[0].mxu0 %v278_v25 }
  0x87   :  { %v60_v31 = vpop.permute.xlu0 %59 }
  0x8c   :  { %v269_v38 = vpop.permute.xlu0 %268 }
  0xdf   :  { %v258_v26 = vpop.f32.mrb[0].mxu1 }
  0xe0   :  { %v331_v27 = vpop.f32.mrb[1].mxu1 }
  0xe1   :  { %v261_v28 = vpop.f32.mrb[2].mxu1 }
  0xe2   :  { %v332_v29 = vpop.f32.mrb[3].mxu1 }
  0xf5   :  { %v316_v30 = vpop.f32.mrb[0].mxu0 }
  0xf6   :  { %v317_v32 = vpop.f32.mrb[1].mxu0 }
  0xf7   :  { %v318_v33 = vadd.f32 %v317_v32, %v316_v30  ;;  %v319_v34 = vpop.f32.mrb[2].mxu0 }
  0xf8   :  { %v320_v35 = vpop.f32.mrb[3].mxu0 }
  0xf9   :  { %v219_v36 = vadd.f32 %v318_v33, %v60_v31 }
  0xfb   :  { %v259_v37 = vadd.f32 %v258_v26, %v219_v36 }
  0xfd   :  { %vm264_vm2 = vcmp.ge.f32.partialorder %v259_v37, 0.0  ;;  %v271_v39 = vmul.f32 %v269_v38, %v259_v37 }
  0xff   :  { %v272_v40 = vsel %vm264_vm2, %v259_v37, %v271_v39 }
 0x100   :  { %273 = vst [vmem:[%s459_s4] sm:$0xff] %v272_v40 }

// kernel: efblock_forward.20
= control target key start
LH: loop header
LB: loop body
LE: loop exit
PB: predicated region body
PF: predicated region fallthrough
CT: control target
= control target key end

     0   :  { %s176_s0 = inlined_call_operand.vmem [shape: f32[16,64], index: 0, kind: input, shape index: {}]   ;;  %s177_s1 = inlined_call_operand.vmem [shape: f32[16,64], index: 1, kind: input, shape index: {}]   ;;  %s178_s2 = inlined_call_operand.vmem [shape: f32[16,64], index: 2, kind: input, shape index: {}]   ;;  %s179_s3 = inlined_call_operand.vmem [shape: f32[16,64], index: 3, kind: input, shape index: {}]   ;;  %s180_s4 = inlined_call_operand.vmem [shape: f32[1,64], index: 4, kind: input, shape index: {}]   ;;  %s181_s5 = inlined_call_operand.vmem [shape: f32[1,64], index: 5, kind: input, shape index: {}]   ;;  %s182_s6 = inlined_call_operand.vmem [shape: f32[1,64], index: 6, kind: input, shape index: {}]   ;;  %s183_s7 = inlined_call_operand.vmem [shape: f32[1,64], index: 7, kind: input, shape index: {}]   ;;  %s184_s8 = inlined_call_operand.vmem [shape: f32[16,64], index: 8, kind: output, shape index: {}]  }
   0x1   :  { %v85_v0 = vld [vmem:[%s180_s4] ss:$0 sm:$0xff]  ;;  %v31_v11 = vld [vmem:[%s176_s0 + $0x8] sm:$0xff] }
   0x2   :  { %v30_v1 = vld [vmem:[%s176_s0] sm:$0xff]  ;;  %v39_v12 = vmul.f32 %v85_v0, %v31_v11  ;;  %v42_v13 = vld [vmem:[%s177_s1 + $0x8] sm:$0xff] }
   0x3   :  { %v86_v2 = vld [vmem:[%s181_s5] ss:$0 sm:$0xff]  ;;  %v38_v3 = vmul.f32 %v85_v0, %v30_v1  ;;  %v55_v14 = vld [vmem:[%s178_s2 + $0x8] sm:$0xff] }
   0x4   :  { %v41_v4 = vld [vmem:[%s177_s1] sm:$0xff]  ;;  %v68_v15 = vld [vmem:[%s179_s3 + $0x8] sm:$0xff]  ;;  %v50_v18 = vmul.f32 %v86_v2, %v42_v13 }
   0x5   :  { %v87_v5 = vld [vmem:[%s182_s6] ss:$0 sm:$0xff]  ;;  %v49_v7 = vmul.f32 %v86_v2, %v41_v4 }
   0x6   :  { %v54_v6 = vld [vmem:[%s178_s2] sm:$0xff]  ;;  %v63_v19 = vmul.f32 %v87_v5, %v55_v14  ;;  %v52_v21 = vadd.f32 %v50_v18, %v39_v12 }
   0x7   :  { %v62_v8 = vmul.f32 %v87_v5, %v54_v6  ;;  %v88_v9 = vld [vmem:[%s183_s7] ss:$0 sm:$0xff]  ;;  %v51_v16 = vadd.f32 %v49_v7, %v38_v3 }
   0x8   :  { %v67_v10 = vld [vmem:[%s179_s3] sm:$0xff]  ;;  %v76_v22 = vmul.f32 %v88_v9, %v68_v15  ;;  %v65_v24 = vadd.f32 %v63_v19, %v52_v21 }
   0x9   :  { %v75_v17 = vmul.f32 %v88_v9, %v67_v10  ;;  %v64_v20 = vadd.f32 %v62_v8, %v51_v16 }
   0xa   :  { %v78_v25 = vadd.f32 %v76_v22, %v65_v24 }
   0xb   :  { %v77_v23 = vadd.f32 %v75_v17, %v64_v20 }
   0xc   :  { %80 = vst [vmem:[%s184_s8 + $0x8] sm:$0xff] %v78_v25 }
   0xd   :  { %79 = vst [vmem:[%s184_s8] sm:$0xff] %v77_v23 }

// kernel: efblock_forward.21
= control target key start
LH: loop header
LB: loop body
LE: loop exit
PB: predicated region body
PF: predicated region fallthrough
CT: control target
= control target key end

     0   :  { %v152_v0 = vmov 0.0   ;;  %vm60_vm0 = vcmask 1046528   ;;  %vm153_vm1 = vmmov 0   ;;  %vm61_vm2 = vcmask 1047552   ;;  %s205_s1 = inlined_call_operand.vmem [shape: bf16[63,128], index: 1, kind: input, shape index: {}]   ;;  %s206_s2 = inlined_call_operand.vmem [shape: f32[8,1], index: 2, kind: input, shape index: {}]   ;;  %s207_s3 = inlined_call_operand.vmem [shape: f32[8,1], index: 3, kind: input, shape index: {}]   ;;  %s208_s0 = inlined_call_operand.vmem [shape: bf16[8,63], index: 0, kind: input, shape index: {}]   ;;  %s209_s4 = inlined_call_operand.vmem [shape: f32[8,128], index: 4, kind: output, shape index: {}]  }
   0x1   :  { %131 = vmatprep.subr.bf16.mxu0 %v152_v0  ;;  %v148_v1 = vld [vmem:[%s205_s1] sm:$0xff]   ;;  %v149_v2 = vld [vmem:[%s205_s1 + $0x8] sm:$0xff]   ;;  %139 = vmatprep.mubr.msk.bf16.mxu0 %vm153_vm1, %v152_v0  ;;  %v154_v3 = vmov 65535   ;;  %v155_v6 = vmov 0   ;;  %v150_v7 = vld [vmem:[%s205_s1 + $0x10] sm:$0xff]   ;;  %vm56_vm3 = vcmask 515072  }
   0x2   :  { %132 = vmatpush3.bf16.msra.mxu0 %v148_v1  ;;  %v62_v4 = vsel %vm60_vm0, 4294967295, %v154_v3  ;;  %v27_v5 = vld [vmem:[%s206_s2] sm:$0xff]  ;;  %147 = vset.pattern.permute.xlu0 %v155_v6  ;;  %v151_v8 = vld [vmem:[%s205_s1 + $0x18] sm:$0xff]  }
   0x3   :  { %133 = vmatprep.subr.bf16.mxu0 %v152_v0  ;;  %30 = vperm.xlu0 %147, %v27_v5   ;;  %v63_v9 = vsel %vm61_vm2, %v62_v4, 0  ;;  %v108_v10 = vld [vmem:[%s207_s3] sm:$0xff] }
   0x4   :  { %v65_v11 = vand.u32 %v151_v8, %v63_v9  ;;  %v18_v12 = vld [vmem:[%s208_s0] sm:$0xf] }
   0x6   :  { %134 = vmatpush3.bf16.msra.mxu0 %v149_v2 }
   0x7   :  { %135 = vmatprep.subr.bf16.mxu0 %v152_v0  ;;  %111 = vperm.xlu0 %147, %v108_v10  }
   0xa   :  { %136 = vmatpush3.bf16.msra.mxu0 %v150_v7 }
   0xb   :  { %137 = vmatprep.subr.bf16.mxu0 %v152_v0 }
   0xe   :  { %138 = vmatpush3.bf16.msra.mxu0 %v65_v11 }
  0x11   :  { %140 = vmatmul.mubr.msk.bf16.vlgmr.msra.gmra.mrb[0].mxu0 %vm56_vm3, %v18_v12 }
  0x82   :  { %v31_v13 = vpop.permute.xlu0 %30 }
  0x86   :  { %v112_v17 = vpop.permute.xlu0 %111 }
  0xe4   :  { %v101_v14 = vpop.f32.mrb[0].mxu0 }
  0xe5   :  { %v102_v15 = vadd.f32 %v101_v14, %v31_v13  ;;  %v141_v16 = vpop.f32.mrb[1].mxu0 }
  0xe6   :  { %v104_v18 = vpop.f32.mrb[2].mxu0 }
  0xe7   :  { %vm107_vm4 = vcmp.ge.f32.partialorder %v102_v15, 0.0  ;;  %v114_v19 = vmul.f32 %v112_v17, %v102_v15  ;;  %v142_v20 = vpop.f32.mrb[3].mxu0 }
  0xe9   :  { %v115_v21 = vsel %vm107_vm4, %v102_v15, %v114_v19 }
  0xea   :  { %116 = vst [vmem:[%s209_s4] sm:$0xff] %v115_v21 }

// kernel: efblock_forward.22
= control target key start
LH: loop header
LB: loop body
LE: loop exit
PB: predicated region body
PF: predicated region fallthrough
CT: control target
= control target key end

     0   :  { %v158_v0 = vmov 0.0   ;;  %vm159_vm0 = vmmov 0   ;;  %v160_v2 = vmov 0   ;;  %vm65_vm1 = vcmask 1043456   ;;  %s213_s1 = inlined_call_operand.vmem [shape: bf16[72,128], index: 1, kind: input, shape index: {}]   ;;  %s214_s2 = inlined_call_operand.vmem [shape: f32[8,1], index: 2, kind: input, shape index: {}]   ;;  %s215_s3 = inlined_call_operand.vmem [shape: f32[8,1], index: 3, kind: input, shape index: {}]   ;;  %s216_s0 = inlined_call_operand.vmem [shape: bf16[8,72], index: 0, kind: input, shape index: {}]   ;;  %s217_s4 = inlined_call_operand.vmem [shape: f32[8,128], index: 4, kind: output, shape index: {}]  }
   0x1   :  { %135 = vmatprep.subr.bf16.mxu0 %v158_v0  ;;  %v153_v1 = vld [vmem:[%s213_s1] sm:$0xff]   ;;  %145 = vmatprep.mubr.msk.bf16.mxu0 %vm159_vm0, %v158_v0  ;;  %v154_v3 = vld [vmem:[%s213_s1 + $0x8] sm:$0xff]   ;;  %v155_v5 = vld [vmem:[%s213_s1 + $0x10] sm:$0xff]   ;;  %vm61_vm2 = vcmask 588800  }
   0x2   :  { %152 = vset.pattern.permute.xlu0 %v160_v2  ;;  %136 = vmatpush3.bf16.msra.mxu0 %v153_v1  ;;  %v28_v4 = vld [vmem:[%s214_s2] sm:$0xff]  ;;  %v156_v7 = vld [vmem:[%s213_s1 + $0x18] sm:$0xff]  }
   0x3   :  { %137 = vmatprep.subr.bf16.mxu0 %v158_v0  ;;  %31 = vperm.xlu0 %152, %v28_v4   ;;  %v110_v6 = vld [vmem:[%s215_s3] sm:$0xff] }
   0x4   :  { %v157_v8 = vld [vmem:[%s213_s1 + $0x20] ss:$0 sps:$4 sm:$0xff]  }
   0x5   :  { %v67_v9 = vsel %vm65_vm1, %v157_v8, 0  ;;  %v18_v10 = vld [vmem:[%s216_s0] sm:$0xf] }
   0x6   :  { %138 = vmatpush3.bf16.msra.mxu0 %v154_v3 }
   0x7   :  { %139 = vmatprep.subr.bf16.mxu0 %v158_v0  ;;  %113 = vperm.xlu0 %152, %v110_v6  }
   0xa   :  { %140 = vmatpush3.bf16.msra.mxu0 %v155_v5 }
   0xb   :  { %141 = vmatprep.subr.bf16.mxu0 %v158_v0 }
   0xe   :  { %142 = vmatpush3.bf16.msra.mxu0 %v156_v7 }
   0xf   :  { %143 = vmatprep.subr.bf16.mxu0 %v158_v0 }
  0x12   :  { %144 = vmatpush3.bf16.msra.mxu0 %v67_v9 }
  0x15   :  { %146 = vmatmul.mubr.msk.bf16.vlgmr.msra.gmra.mrb[0].mxu0 %vm61_vm2, %v18_v10 }
  0x82   :  { %v32_v11 = vpop.permute.xlu0 %31 }
  0x86   :  { %v114_v15 = vpop.permute.xlu0 %113 }
  0xe8   :  { %v103_v12 = vpop.f32.mrb[0].mxu0 }
  0xe9   :  { %v104_v13 = vadd.f32 %v103_v12, %v32_v11  ;;  %v147_v14 = vpop.f32.mrb[1].mxu0 }
  0xea   :  { %v106_v16 = vpop.f32.mrb[2].mxu0 }
  0xeb   :  { %vm109_vm3 = vcmp.ge.f32.partialorder %v104_v13, 0.0  ;;  %v116_v17 = vmul.f32 %v114_v15, %v104_v13  ;;  %v148_v18 = vpop.f32.mrb[3].mxu0 }
  0xed   :  { %v117_v19 = vsel %vm109_vm3, %v104_v13, %v116_v17 }
  0xee   :  { %118 = vst [vmem:[%s217_s4] sm:$0xff] %v117_v19 }

// kernel: tile.8
= control target key start
LH: loop header
LB: loop body
LE: loop exit
PB: predicated region body
PF: predicated region fallthrough
CT: control target
= control target key end

     0   :  { %s22_s0 = inlined_call_operand.vmem [shape: f32[5], index: 0, kind: input, shape index: {}]   ;;  %s23_s1 = inlined_call_operand.vmem [shape: f32[4,5], index: 1, kind: output, shape index: {}]  }
   0x1   :  { %v4_v0 = vld [vmem:[%s22_s0] ss:$0 sm:$0xff] }
   0x2   :  { %5 = vst [vmem:[%s23_s1] sm:$0xf] %v4_v0 }

// kernel: tile.0
= control target key start
LH: loop header
LB: loop body
LE: loop exit
PB: predicated region body
PF: predicated region fallthrough
CT: control target
= control target key end

     0   :  { %s42_s8 = smov 127   ;;  %vm7_vm0 = vcmask 7168   ;;  %s43_s11 = smov 124   ;;  %s78_s0 = inlined_call_operand.vmem [shape: f32[4,5], index: 0, kind: input, shape index: {}]   ;;  %s79_s1 = inlined_call_operand.vmem [shape: f32[20,1], index: 1, kind: output, shape index: {}]  }
   0x1   :  { %v4_v0 = vld [vmem:[%s78_s0] sm:$0xf]  ;;  %s41_s0 = smov 125   ;;  %s44_s12 = smov 126  }
   0x2   :  { %5 = vst [vmem:[#allocation0] sm:$0xf] %v4_v0 }
   0x9   :  { %v21_v1 = vld [vmem:[#allocation0] sm:$0xf]  }
   0xa   :  { %v9_v2 = vld [vmem:[#allocation0] sm:$0xf]   ;;  %22 = vrot.lane.b32.xlu1 %v21_v1, %s41_s0 }
   0xb   :  { %10 = vrot.lane.b32.xlu0 %v9_v2, %s42_s8  ;;  %v6_v3 = vld [vmem:[#allocation0] sm:$0xf]  }
   0xc   :  { %v27_v4 = vld [vmem:[#allocation0] sm:$0xf]   ;;  %8 = vst.msk [vmem:[%s79_s1] ss:$5 sm:$0xf] %vm7_vm0, %v6_v3  }
   0xd   :  { %v15_v5 = vld [vmem:[#allocation0] sm:$0xf]  }
   0xe   :  { %28 = vrot.lane.b32.xlu1 %v27_v4, %s43_s11 }
   0xf   :  { %16 = vrot.lane.b32.xlu0 %v15_v5, %s44_s12 }
  0x7c   :  { %v23_v6 = vpop.permute.xlu1 %22  }
  0x7d   :  { %v11_v7 = vpop.permute.xlu0 %10   ;;  %35 = vst.msk [vmem:[%s79_s1 + $0x3] ss:$5 sm:$0xf] %vm7_vm0, %v23_v6  }
  0x7e   :  { %33 = vst.msk [vmem:[%s79_s1 + $0x1] ss:$5 sm:$0xf] %vm7_vm0, %v11_v7  }
  0x80   :  { %v29_v8 = vpop.permute.xlu1 %28  }
  0x81   :  { %v17_v9 = vpop.permute.xlu0 %16   ;;  %36 = vst.msk [vmem:[%s79_s1 + $0x4] ss:$5 sm:$0xf] %vm7_vm0, %v29_v8  }
  0x82   :  { %34 = vst.msk [vmem:[%s79_s1 + $0x2] ss:$5 sm:$0xf] %vm7_vm0, %v17_v9  }

// kernel: efblock_forward.23
= control target key start
LH: loop header
LB: loop body
LE: loop exit
PB: predicated region body
PF: predicated region fallthrough
CT: control target
= control target key end

     0   :  { %v236_v1 = vmov 0   ;;  %vm95_vm0 = vcmask 523264   ;;  %s328_s1 = inlined_call_operand.vmem [shape: bf16[64,162], index: 1, kind: input, shape index: {}]   ;;  %s329_s0 = inlined_call_operand.vmem [shape: bf16[20,64], index: 0, kind: input, shape index: {}]   ;;  %s330_s2 = inlined_call_operand.vmem [shape: f32[20,1], index: 2, kind: input, shape index: {}]   ;;  %s331_s3 = inlined_call_operand.vmem [shape: f32[20,1], index: 3, kind: input, shape index: {}]   ;;  %s332_s4 = inlined_call_operand.vmem [shape: f32[20,162], index: 4, kind: output, shape index: {}]  }
   0x1   :  { %v222_v0 = vld [vmem:[%s328_s1 + $0x4] ss:$8 sps:$4 sm:$0xff]   ;;  %134 = vmatprep.mubr.bf16.mxu0 %v236_v1  ;;  %144 = vmatprep.mubr.bf16.mxu1 %v236_v1  ;;  %v224_v2 = vld [vmem:[%s328_s1] ss:$8 sps:$4 sm:$0xff]   ;;  %v225_v3 = vld [vmem:[%s328_s1 + $0x14] ss:$8 sps:$4 sm:$0xff]  }
   0x2   :  { %221 = vset.pattern.permute.xlu1 %v236_v1  ;;  %220 = vset.pattern.permute.xlu0 %v236_v1  ;;  %v227_v4 = vld [vmem:[%s328_s1 + $0x10] ss:$8 sps:$4 sm:$0xff]   ;;  %v228_v5 = vld [vmem:[%s328_s1 + $0x24] ss:$8 sps:$4 sm:$0xff]   ;;  %v230_v6 = vld [vmem:[%s328_s1 + $0x20] ss:$8 sps:$4 sm:$0xff]  }
   0x3   :  { %102 = vmatprep.subr.bf16.mxu0 %v222_v0  ;;  %211 = vmatprep.subr.bf16.mxu1 %v222_v0  ;;  %v31_v7 = vld [vmem:[%s330_s2 + $0x10] sm:$0xf]  ;;  %v29_v8 = vld [vmem:[%s330_s2] sm:$0xff]  ;;  %v231_v9 = vld [vmem:[%s328_s1 + $0x34] ss:$8 sps:$4 sm:$0xff]  }
   0x4   :  { %103 = vmatpush1.bf16.msra.mxu0 %v224_v2  ;;  %215 = vmatpush1.bf16.msra.mxu1 %v224_v2  ;;  %v159_v10 = vld [vmem:[%s331_s3] sm:$0xff]  ;;  %v30_v11 = vld [vmem:[%s330_s2 + $0x8] sm:$0xff]  ;;  %v233_v12 = vld [vmem:[%s328_s1 + $0x30] ss:$8 sps:$4 sm:$0xff]  }
   0x5   :  { %104 = vmatprep.subr.bf16.mxu0 %v225_v3  ;;  %212 = vmatprep.subr.bf16.mxu1 %v225_v3  ;;  %v234_v13 = vld [vmem:[%s329_s0] sm:$0xff]   ;;  %v235_v14 = vld [vmem:[%s329_s0 + $0x8] ss:$0 sps:$4 sm:$0x33]   ;;  %v161_v15 = vld [vmem:[%s331_s3 + $0x10] sm:$0xf] }
   0x6   :  { %44 = vperm.xlu1 %221, %v31_v7   ;;  %34 = vperm.xlu0 %220, %v29_v8   ;;  %v160_v16 = vld [vmem:[%s331_s3 + $0x8] sm:$0xff] }
   0x8   :  { %105 = vmatpush1.bf16.msra.mxu0 %v227_v4  ;;  %216 = vmatpush1.bf16.msra.mxu1 %v227_v4 }
   0x9   :  { %106 = vmatprep.subr.bf16.mxu0 %v228_v5  ;;  %213 = vmatprep.subr.bf16.mxu1 %v228_v5 }
   0xa   :  { %164 = vperm.xlu1 %221, %v159_v10   ;;  %39 = vperm.xlu0 %220, %v30_v11  }
   0xc   :  { %107 = vmatpush1.bf16.msra.mxu0 %v230_v6  ;;  %217 = vmatpush1.bf16.msra.mxu1 %v230_v6 }
   0xd   :  { %108 = vmatprep.subr.bf16.mxu0 %v231_v9  ;;  %214 = vmatprep.subr.bf16.mxu1 %v231_v9 }
   0xe   :  { %174 = vperm.xlu1 %221, %v161_v15   ;;  %169 = vperm.xlu0 %220, %v160_v16  }
  0x10   :  { %109 = vmatpush1.bf16.msra.mxu0 %v233_v12  ;;  %218 = vmatpush1.bf16.msra.mxu1 %v233_v12 }
  0x13   :  { %209 = vmatmul.mubr.msk.bf16.vlgmr.msra.gmra.mrb[0].mxu0 %vm95_vm0, %v234_v13  ;;  %210 = vmatmul.mubr.msk.bf16.vlgmr.msra.gmra.mrb[0].mxu1 %vm95_vm0, %v235_v14 }
  0x85   :  { %v45_v17 = vpop.permute.xlu1 %44  ;;  %v35_v18 = vpop.permute.xlu0 %34 }
  0x89   :  { %v165_v19 = vpop.permute.xlu1 %164  ;;  %v40_v20 = vpop.permute.xlu0 %39 }
  0x8d   :  { %v175_v21 = vpop.permute.xlu1 %174  ;;  %v170_v42 = vpop.permute.xlu0 %169 }
  0xe6   :  { %v136_v22 = vpop.f32.mrb[0].mxu0  ;;  %v146_v23 = vpop.f32.mrb[0].mxu1 }
  0xe7   :  { %v137_v24 = vadd.f32 %v136_v22, %v35_v18  ;;  %v147_v25 = vadd.f32 %v146_v23, %v45_v17  ;;  %v138_v26 = vpop.f32.mrb[1].mxu0  ;;  %v148_v27 = vpop.f32.mrb[1].mxu1 }
  0xe8   :  { %v139_v28 = vadd.f32 %v138_v26, %v35_v18  ;;  %v149_v29 = vadd.f32 %v148_v27, %v45_v17  ;;  %v140_v30 = vpop.f32.mrb[2].mxu0  ;;  %v150_v31 = vpop.f32.mrb[2].mxu1 }
  0xe9   :  { %vm153_vm1 = vcmp.ge.f32.partialorder %v137_v24, 0.0  ;;  %v177_v32 = vmul.f32 %v165_v19, %v137_v24  ;;  %vm157_vm2 = vcmp.ge.f32.partialorder %v147_v25, 0.0  ;;  %v181_v33 = vmul.f32 %v175_v21, %v147_v25  ;;  %v142_v34 = vpop.f32.mrb[3].mxu0  ;;  %v151_v35 = vpop.f32.mrb[3].mxu1 }
  0xea   :  { %vm154_vm3 = vcmp.ge.f32.partialorder %v139_v28, 0.0  ;;  %v178_v36 = vmul.f32 %v165_v19, %v139_v28  ;;  %vm158_vm4 = vcmp.ge.f32.partialorder %v149_v29, 0.0  ;;  %v182_v37 = vmul.f32 %v175_v21, %v149_v29 }
  0xeb   :  { %v183_v38 = vsel %vm153_vm1, %v137_v24, %v177_v32  ;;  %v187_v39 = vsel %vm157_vm2, %v147_v25, %v181_v33  ;;  %v141_v40 = vadd.f32 %v140_v30, %v40_v20  ;;  %v143_v41 = vadd.f32 %v142_v34, %v40_v20 }
  0xec   :  { %189 = vst [vmem:[%s332_s4] sm:$0xff] %v183_v38  ;;  %193 = vst [vmem:[%s332_s4 + $0x20] sm:$0xf] %v187_v39  ;;  %v184_v43 = vsel %vm154_vm3, %v139_v28, %v178_v36  ;;  %v188_v44 = vsel %vm158_vm4, %v149_v29, %v182_v37 }
  0xed   :  { %190 = vst [vmem:[%s332_s4 + $0x8] sm:$0xff] %v184_v43  ;;  %194 = vst [vmem:[%s332_s4 + $0x28] sm:$0xf] %v188_v44  ;;  %vm155_vm5 = vcmp.ge.f32.partialorder %v141_v40, 0.0  ;;  %v179_v45 = vmul.f32 %v170_v42, %v141_v40  ;;  %vm156_vm6 = vcmp.ge.f32.partialorder %v143_v41, 0.0  ;;  %v180_v46 = vmul.f32 %v170_v42, %v143_v41 }
  0xef   :  { %v185_v47 = vsel %vm155_vm5, %v141_v40, %v179_v45  ;;  %v186_v48 = vsel %vm156_vm6, %v143_v41, %v180_v46 }
  0xf0   :  { %191 = vst [vmem:[%s332_s4 + $0x10] sm:$0xff] %v185_v47  ;;  %192 = vst [vmem:[%s332_s4 + $0x18] sm:$0xff] %v186_v48 }

</bundles_post_ra>
